<compile_context>
chip_gen: v5e
topology: v5e:2x2
jax: 0.10.0
libtpu: 0.0.40
codegen_flags: <defaults>
</compile_context>

<pallas_src>
import functools
import math

import jax
import jax.numpy as jnp
import numpy as np
from jax.experimental import pallas as pl
from jax.experimental.pallas import tpu as pltpu

LANE = 128
_VMEM_LIMIT = 32 * 1024 * 1024


def _round_up(n, m):
    return ((n + m - 1) // m) * m


def _row_tile(n):
    """Largest row tile <= n//2 (so >=2 blocks when possible) that divides n."""
    for t in (512, 256, 128, 64, 32, 16, 8):
        if t <= n // 2 and n % t == 0:
            return t
    return n


def _chunk_len(L, target=16):
    """Sites per grid step for the environment scans."""
    for c in (32, 16, 8, 4, 2, 1):
        if c <= target and c <= L and L % c == 0:
            return c
    return 1


# ----------------------------------------------------------------------------
# Kernel 1: fused feature -> transfer-matrix contraction
#   (L*B, Ppad) @ (Ppad, 2*D*D)  ->  [Tl | Tr^T]   (bf16 MXU, f32 accumulate)
# ----------------------------------------------------------------------------
def _transfer_kernel(x_ref, a_ref, t_ref):
    t_ref[...] = jnp.dot(x_ref[...].astype(jnp.bfloat16), a_ref[...],
                         preferred_element_type=jnp.float32)


def transfer_matrices(x2, a_cat):
    n, fpad = x2.shape
    _, n_out = a_cat.shape
    tn = _row_tile(n)
    return pl.pallas_call(
        _transfer_kernel,
        out_shape=jax.ShapeDtypeStruct((n, n_out), jnp.float32),
        grid=(n // tn,),
        in_specs=[pl.BlockSpec((tn, fpad), lambda i: (i, 0)),
                  pl.BlockSpec((fpad, n_out), lambda i: (0, 0))],
        out_specs=pl.BlockSpec((tn, n_out), lambda i: (i, 0)),
        compiler_params=pltpu.CompilerParams(
            dimension_semantics=("parallel",),
            vmem_limit_bytes=_VMEM_LIMIT),
    )(x2, a_cat)


# ----------------------------------------------------------------------------
# Kernel 2: fused left + right environment scans, chunked along the chain.
#   t_st has shape (L, B, 2*D, D): rows [:D] hold Tl, rows [D:] hold Tr^T, so
#   both scans use the identical sublane-axis update  h <- sum_i h[i] * T[i, :].
# ----------------------------------------------------------------------------
def _scan_kernel(tf_ref, tr_ref, hl_out, hr_out, hl_acc, hr_acc, *, Lc, Bb, D):
    @pl.when(pl.program_id(1) == 0)
    def _():
        init = jnp.full((Bb, D), 1.0 / math.sqrt(D), dtype=jnp.float32)
        hl_acc[...] = init
        hr_acc[...] = init

    hl = hl_acc[...]
    hr = hr_acc[...]
    for i in range(Lc):                      # fully unrolled, Lc is small/static
        # left scan: forward order within the forward chunk
        hl_out[i] = hl
        hl = jnp.sum(hl[:, :, None] * tf_ref[i], axis=1)
        # right scan: backward order within the reversed chunk (Tr^T half)
        j = Lc - 1 - i
        hr_out[j] = hr
        hr = jnp.sum(hr[:, :, None] * tr_ref[j], axis=1)
    hl_acc[...] = hl
    hr_acc[...] = hr


def environment_scans(t_st, D):
    L, B, _, _ = t_st.shape
    Lc = _chunk_len(L)
    nc = L // Lc
    # split batch across a leading "parallel" grid dim when the halves still
    # satisfy the (8, 128) sublane constraint of the output blocks.
    Bb = B // 2 if (B % 2 == 0 and (B // 2) % 8 == 0) else B
    nb = B // Bb
    kernel = functools.partial(_scan_kernel, Lc=Lc, Bb=Bb, D=D)
    return pl.pallas_call(
        kernel,
        out_shape=(jax.ShapeDtypeStruct((L, B, D), jnp.float32),
                   jax.ShapeDtypeStruct((L, B, D), jnp.float32)),
        grid=(nb, nc),
        in_specs=[pl.BlockSpec((Lc, Bb, D, D), lambda b, c: (c, b, 0, 0)),
                  pl.BlockSpec((Lc, Bb, D, D),
                               lambda b, c: (nc - 1 - c, b, 1, 0))],
        out_specs=(pl.BlockSpec((Lc, Bb, D), lambda b, c: (c, b, 0)),
                   pl.BlockSpec((Lc, Bb, D), lambda b, c: (nc - 1 - c, b, 0))),
        scratch_shapes=[pltpu.VMEM((Bb, D), jnp.float32),
                        pltpu.VMEM((Bb, D), jnp.float32)],
        compiler_params=pltpu.CompilerParams(
            dimension_semantics=("parallel", "arbitrary"),
            vmem_limit_bytes=_VMEM_LIMIT),
    )(t_st, t_st)


# ----------------------------------------------------------------------------
# Kernel 3: outer product (hL (x) hR) + projection + activation + rmsnorm +
#           per-layer residual.  F never leaves VMEM.
# ----------------------------------------------------------------------------
def _project_kernel(hl_ref, hr_ref, x_ref, er_ref, et_ref, w_ref, o_ref, *,
                    scale, res_coef, inv_dout, eps, use_residual, use_norm,
                    activation):
    # Expand hL -> hL[i] at lane i*D+j, hR -> hR[j] at lane i*D+j using 0/1
    # selector matmuls (exact; avoids an in-kernel (r,D,D)->(r,D*D) reshape).
    hl_e = jnp.dot(hl_ref[...], er_ref[...],
                   precision=jax.lax.Precision.HIGHEST,
                   preferred_element_type=jnp.float32)
    hr_t = jnp.dot(hr_ref[...], et_ref[...],
                   precision=jax.lax.Precision.HIGHEST,
                   preferred_element_type=jnp.float32)
    f = (hl_e * hr_t).astype(jnp.bfloat16)      # F = hL (x) hR, VMEM only
    y = jnp.dot(f, w_ref[...], preferred_element_type=jnp.float32)
    if activation == "tanh":
        y = jnp.tanh(y)
    elif activation == "relu":
        y = jnp.maximum(y, 0.0)
    # TODO(synk): other TDVP_V2 activation choices (source unavailable) not implemented.
    y = y * scale
    if use_norm:
        # padded output columns are exactly 0, so sum/real_dout == rms over dout
        ms = jnp.sum(y * y, axis=-1, keepdims=True) * inv_dout
        y = y * jax.lax.rsqrt(ms + eps)
    if use_residual:
        y = y + x_ref[...] * res_coef
    o_ref[...] = y


def output_project(hl2, hr2, x2, e_rep, e_til, w_pad, *, scale, res_coef,
                   dout_real, eps, use_residual, use_norm, activation):
    n, D = hl2.shape
    D2, fpad = w_pad.shape
    tn = _row_tile(n)
    kernel = functools.partial(
        _project_kernel, scale=scale, res_coef=res_coef,
        inv_dout=1.0 / dout_real, eps=eps, use_residual=use_residual,
        use_norm=use_norm, activation=activation)
    return pl.pallas_call(
        kernel,
        out_shape=jax.ShapeDtypeStruct((n, fpad), jnp.float32),
        grid=(n // tn,),
        in_specs=[pl.BlockSpec((tn, D), lambda i: (i, 0)),
                  pl.BlockSpec((tn, D), lambda i: (i, 0)),
                  pl.BlockSpec((tn, fpad), lambda i: (i, 0)),
                  pl.BlockSpec((D, D2), lambda i: (0, 0)),
                  pl.BlockSpec((D, D2), lambda i: (0, 0)),
                  pl.BlockSpec((D2, fpad), lambda i: (0, 0))],
        out_specs=pl.BlockSpec((tn, fpad), lambda i: (i, 0)),
        compiler_params=pltpu.CompilerParams(
            dimension_semantics=("parallel",),
            vmem_limit_bytes=_VMEM_LIMIT),
    )(hl2, hr2, x2, e_rep, e_til, w_pad)


# ----------------------------------------------------------------------------
# TDVP_V2 forward (Pallas) and MultiTDVP_V2 wrapper
# ----------------------------------------------------------------------------
def _selector_matrices(D):
    e_rep = np.kron(np.eye(D, dtype=np.float32), np.ones((1, D), np.float32))
    e_til = np.kron(np.ones((1, D), np.float32), np.eye(D, dtype=np.float32))
    return jnp.asarray(e_rep), jnp.asarray(e_til)         # each (D, D*D)


def _prepare_layer(p, D, fpad):
    """Fused/padded layer parameters (done once per layer, outside nrep)."""
    P, D2 = p["Al"].shape
    ar_t = p["Ar"].reshape(P, D, D).transpose(0, 2, 1).reshape(P, D2)
    a_cat = jnp.concatenate([p["Al"], ar_t], axis=1)              # (P, 2*D2)
    a_cat = jnp.pad(a_cat, ((0, fpad - P), (0, 0))).astype(jnp.bfloat16)
    dout = p["Wout"].shape[1]
    w_pad = jnp.pad(p["Wout"], ((0, 0), (0, fpad - dout))).astype(jnp.bfloat16)
    return a_cat, w_pad, dout


def tdvp_layer(x_lb, a_cat, w_pad, e_rep, e_til, p, cfg, *, din_real, dout_real):
    """x_lb: (L, B, fpad) padded, l-major.  Returns (L, B, fpad)."""
    L, B, fpad = x_lb.shape
    D = cfg["Dtdvp"]
    n = L * B
    x2 = x_lb.reshape(n, fpad)
    t = transfer_matrices(x2, a_cat)           # (n, 2*D*D): [Tl | Tr^T]
    t_st = t.reshape(L, B, 2 * D, D)           # Tl in rows :D, Tr^T in rows D:
    hL, hR = environment_scans(t_st, D)        # (L, B, D) each
    y2 = output_project(
        hL.reshape(n, D), hR.reshape(n, D), x2, e_rep, e_til, w_pad,
        scale=cfg["scale"], res_coef=p["res_coef"], dout_real=dout_real,
        eps=cfg["eps_tdvp"],
        use_residual=bool(cfg["residual"]) and (din_real == dout_real),
        use_norm=bool(cfg["out_norm"]), activation=cfg["activation"])
    return y2.reshape(L, B, fpad)


def multi_tdvp_forward(inputs, params, cfg):
    """inputs: (B, L, P) -> (y (B, L, dout), Als, Ars)."""
    B, L, P = inputs.shape
    D = cfg["Dtdvp"]
    fpad = _round_up(max(cfg["feature_dim"], cfg["dout"]), LANE)
    # single small transpose + pad up front; everything stays (L, B, fpad)
    x = jnp.pad(jnp.transpose(inputs, (1, 0, 2)),
                ((0, 0), (0, 0), (0, fpad - P)))
    x0 = x
    e_rep, e_til = _selector_matrices(D)
    Als = Ars = None
    # TODO(synk): cyclic boundary contraction not implemented (open-boundary assumed).
    for p in params["tdvps"]:
        a_cat, w_pad, dout_real = _prepare_layer(p, D, fpad)
        for _ in range(cfg["nrep"]):
            x = tdvp_layer(x, a_cat, w_pad, e_rep, e_til, p, cfg,
                           din_real=cfg["feature_dim"], dout_real=dout_real)
        Als, Ars = p["Al"], p["Ar"]
    if (cfg["residual"] and cfg["ntdvp"] * cfg["nrep"] > 1
            and cfg["feature_dim"] == cfg["dout"]):
        x = x + x0 * params["global_res_coef"]
    y = jnp.transpose(x[:, :, :cfg["dout"]], (1, 0, 2))
    return y, Als, Ars


# ----------------------------------------------------------------------------
# Pure-JAX reference (same math; matmuls use the same bf16-input / f32-accum
# convention as the kernels so the comparison is apples-to-apples).
# ----------------------------------------------------------------------------
def tdvp_reference(x, p, cfg):
    B, L, P = x.shape
    D = cfg["Dtdvp"]
    dout = p["Wout"].shape[1]
    bf = jnp.bfloat16
    Al3 = p["Al"].reshape(P, D, D)
    Ar3 = p["Ar"].reshape(P, D, D)
    Tl = jnp.einsum("blp,pij->blij", x.astype(bf), Al3.astype(bf),
                    preferred_element_type=jnp.float32)
    Tr = jnp.einsum("blp,pij->blij", x.astype(bf), Ar3.astype(bf),
                    preferred_element_type=jnp.float32)
    h0 = jnp.full((B, D), 1.0 / math.sqrt(D), dtype=jnp.float32)
    hL = [h0]
    for l in range(L - 1):
        hL.append(jnp.sum(hL[-1][:, :, None] * Tl[:, l], axis=1))
    hL = jnp.stack(hL, axis=1)                                   # (B, L, D)
    hR = [h0]
    for l in range(L - 1, 0, -1):
        hR.append(jnp.sum(Tr[:, l] * hR[-1][:, None, :], axis=2))
    hR = jnp.stack(hR[::-1], axis=1)                             # (B, L, D)
    F = (hL[:, :, :, None] * hR[:, :, None, :]).reshape(B, L, D * D)
    y = jnp.einsum("blk,ko->blo", F.astype(bf), p["Wout"].astype(bf),
                   preferred_element_type=jnp.float32)
    if cfg["activation"] == "tanh":
        y = jnp.tanh(y)
    elif cfg["activation"] == "relu":
        y = jnp.maximum(y, 0.0)
    y = y * cfg["scale"]
    if cfg["out_norm"]:
        ms = jnp.mean(y * y, axis=-1, keepdims=True)
        y = y * jax.lax.rsqrt(ms + cfg["eps_tdvp"])
    if cfg["residual"] and P == dout:
        y = y + x * p["res_coef"]
    return y, p["Al"], p["Ar"]


def multi_tdvp_reference(inputs, params, cfg):
    x = inputs
    Als = Ars = None
    for p in params["tdvps"]:
        for _ in range(cfg["nrep"]):
            x, Als, Ars = tdvp_reference(x, p, cfg)
    if (cfg["residual"] and cfg["ntdvp"] * cfg["nrep"] > 1
            and cfg["feature_dim"] == cfg["dout"]):
        x = x + inputs * params["global_res_coef"]
    return x, Als, Ars


# ----------------------------------------------------------------------------
# Deterministic parameter init (synthetic; matches __init__ shapes conceptually)
# ----------------------------------------------------------------------------
def init_tdvp_params(key, P, dout, D):
    k1, k2, k3 = jax.random.split(key, 3)
    D2 = D * D
    eye = jnp.eye(D, dtype=jnp.float32).reshape(1, D2)
    # near-identity transfer matrices keep the environment scans well-conditioned
    Al = (jnp.tile(eye, (P, 1)) / P
          + 0.05 * jax.random.normal(k1, (P, D2), dtype=jnp.float32))
    Ar = (jnp.tile(eye, (P, 1)) / P
          + 0.05 * jax.random.normal(k2, (P, D2), dtype=jnp.float32))
    Wout = jax.random.normal(k3, (D2, dout), dtype=jnp.float32) / math.sqrt(D2)
    return {"Al": Al, "Ar": Ar, "Wout": Wout, "res_coef": 1.0}


def init_multi_params(key, cfg):
    keys = jax.random.split(key, cfg["ntdvp"])
    tdvps = []
    for i in range(cfg["ntdvp"]):
        dout_i = cfg["feature_dim"] if i < cfg["ntdvp"] - 1 else cfg["dout"]
        tdvps.append(init_tdvp_params(keys[i], cfg["feature_dim"], dout_i,
                                      cfg["Dtdvp"]))
    return {"tdvps": tdvps, "global_res_coef": 1.0}


if __name__ == "__main__":
    cfg = dict(
        input_dim=8,        # chain length L
        feature_dim=4,      # din
        dout=4,
        Dtdvp=8,            # bond dimension D
        ntdvp=2,
        nrep=2,
        residual=True,
        scale=1.0,
        ti=True,
        cyclic=False,
        out_norm=True,
        activation="tanh",
        mode="parallel",    # TODO(synk): TDVP_V2 'mode'/'trainable_A' variants unknown; single documented mode used
        eps_tdvp=1e-6,
        trainable_A=True,
        cuda=False,
    )

    key = jax.random.PRNGKey(0)
    kx, kp = jax.random.split(key)
    B, L, P = 2, cfg["input_dim"], cfg["feature_dim"]
    x = jax.random.normal(kx, (B, L, P), dtype=jnp.float32)
    params = init_multi_params(kp, cfg)

    fwd = jax.jit(lambda xx: multi_tdvp_forward(xx, params, cfg))
    y, Als, Ars = fwd(x)
    y = jax.block_until_ready(y)

    y_ref, _, _ = multi_tdvp_reference(x, params, cfg)
    np.testing.assert_allclose(np.asarray(y), np.asarray(y_ref),
                               rtol=3e-3, atol=3e-3)
    print("KERNEL_OK")
</pallas_src>

<mosaic_0001>
module attributes {stable_mosaic.version = 11 : i64} {
  func.func @_transfer_kernel(%arg0: i32, %arg1: memref<8x128xf32, #tpu.memory_space<vmem>>, %arg2: memref<128x128xbf16, #tpu.memory_space<vmem>>, %arg3: memref<8x128xf32, #tpu.memory_space<vmem>>) attributes {dimension_semantics = [#tpu.dimension_semantics<parallel>], iteration_bounds = array<i64: 2>, scalar_prefetch = 0 : i64, scratch_operands = 0 : i64, tpu.core_type = #tpu.core_type<tc>, window_params = [{transform_indices = @transform_0, window_bounds = array<i64: 8, 128>}, {pipeline_mode = #tpu.pipeline_mode<synchronous>, transform_indices = @transform_1, window_bounds = array<i64: 128, 128>}, {transform_indices = @transform_2, window_bounds = array<i64: 8, 128>}]} {
    %c0 = arith.constant 0 : index
    %c0_0 = arith.constant 0 : index
    %0 = vector.load %arg1[%c0, %c0_0] : memref<8x128xf32, #tpu.memory_space<vmem>>, vector<8x128xf32>
    %1 = arith.truncf %0 : vector<8x128xf32> to vector<8x128xbf16>
    %c0_1 = arith.constant 0 : index
    %c0_2 = arith.constant 0 : index
    %2 = vector.load %arg2[%c0_1, %c0_2] : memref<128x128xbf16, #tpu.memory_space<vmem>>, vector<128x128xbf16>
    %cst = arith.constant dense<0.000000e+00> : vector<8x128xf32>
    %3 = tpu.matmul %1, %2, %cst {dimension_numbers = #tpu.dot_dimension_numbers<[1], [0], [0], [1], [0, 0, 1, 1], [], []>} : vector<8x128xbf16>, vector<128x128xbf16>, vector<8x128xf32> -> vector<8x128xf32>
    %c0_3 = arith.constant 0 : index
    %c0_4 = arith.constant 0 : index
    %4 = vector.load %arg3[%c0_3, %c0_4] : memref<8x128xf32, #tpu.memory_space<vmem>>, vector<8x128xf32>
    tpu.vector_store %arg3[%c0_3, %c0_4], %3 {strides = array<i32>} : memref<8x128xf32, #tpu.memory_space<vmem>>, vector<8x128xf32>,
    return
  }
  func.func @transform_0(%arg0: i32) -> (i32, i32) {
    %c0_i32 = arith.constant 0 : i32
    %c0_i32_0 = arith.constant 0 : i32
    return %arg0, %c0_i32 : i32, i32
  }
  func.func @transform_1(%arg0: i32) -> (i32, i32) {
    %c0_i32 = arith.constant 0 : i32
    %c0_i32_0 = arith.constant 0 : i32
    %c0_i32_1 = arith.constant 0 : i32
    return %c0_i32, %c0_i32_0 : i32, i32
  }
  func.func @transform_2(%arg0: i32) -> (i32, i32) {
    %c0_i32 = arith.constant 0 : i32
    %c0_i32_0 = arith.constant 0 : i32
    return %arg0, %c0_i32 : i32, i32
  }
}

module attributes {stable_mosaic.version = 11 : i64} {
  func.func @_project_kernel(%arg0: i32, %arg1: memref<8x8xf32, #tpu.memory_space<vmem>>, %arg2: memref<8x8xf32, #tpu.memory_space<vmem>>, %arg3: memref<8x128xf32, #tpu.memory_space<vmem>>, %arg4: memref<8x64xf32, #tpu.memory_space<vmem>>, %arg5: memref<8x64xf32, #tpu.memory_space<vmem>>, %arg6: memref<64x128xbf16, #tpu.memory_space<vmem>>, %arg7: memref<8x128xf32, #tpu.memory_space<vmem>>) attributes {dimension_semantics = [#tpu.dimension_semantics<parallel>], iteration_bounds = array<i64: 2>, scalar_prefetch = 0 : i64, scratch_operands = 0 : i64, tpu.core_type = #tpu.core_type<tc>, window_params = [{transform_indices = @transform_0, window_bounds = array<i64: 8, 8>}, {transform_indices = @transform_1, window_bounds = array<i64: 8, 8>}, {transform_indices = @transform_2, window_bounds = array<i64: 8, 128>}, {pipeline_mode = #tpu.pipeline_mode<synchronous>, transform_indices = @transform_3, window_bounds = array<i64: 8, 64>}, {pipeline_mode = #tpu.pipeline_mode<synchronous>, transform_indices = @transform_4, window_bounds = array<i64: 8, 64>}, {pipeline_mode = #tpu.pipeline_mode<synchronous>, transform_indices = @transform_5, window_bounds = array<i64: 64, 128>}, {transform_indices = @transform_6, window_bounds = array<i64: 8, 128>}]} {
    %c0 = arith.constant 0 : index
    %c0_0 = arith.constant 0 : index
    %0 = vector.load %arg1[%c0, %c0_0] : memref<8x8xf32, #tpu.memory_space<vmem>>, vector<8x8xf32>
    %c0_1 = arith.constant 0 : index
    %c0_2 = arith.constant 0 : index
    %1 = vector.load %arg4[%c0_1, %c0_2] : memref<8x64xf32, #tpu.memory_space<vmem>>, vector<8x64xf32>
    %cst = arith.constant dense<0.000000e+00> : vector<8x64xf32>
    %2 = tpu.matmul %0, %1, %cst {dimension_numbers = #tpu.dot_dimension_numbers<[1], [0], [0], [1], [0, 0, 1, 1], [], []>, precision = #tpu.contract_precision<fp32>} : vector<8x8xf32>, vector<8x64xf32>, vector<8x64xf32> -> vector<8x64xf32>
    %c0_3 = arith.constant 0 : index
    %c0_4 = arith.constant 0 : index
    %3 = vector.load %arg2[%c0_3, %c0_4] : memref<8x8xf32, #tpu.memory_space<vmem>>, vector<8x8xf32>
    %c0_5 = arith.constant 0 : index
    %c0_6 = arith.constant 0 : index
    %4 = vector.load %arg5[%c0_5, %c0_6] : memref<8x64xf32, #tpu.memory_space<vmem>>, vector<8x64xf32>
    %cst_7 = arith.constant dense<0.000000e+00> : vector<8x64xf32>
    %5 = tpu.matmul %3, %4, %cst_7 {dimension_numbers = #tpu.dot_dimension_numbers<[1], [0], [0], [1], [0, 0, 1, 1], [], []>, precision = #tpu.contract_precision<fp32>} : vector<8x8xf32>, vector<8x64xf32>, vector<8x64xf32> -> vector<8x64xf32>
    %6 = arith.mulf %2, %5 : vector<8x64xf32>
    %7 = arith.truncf %6 : vector<8x64xf32> to vector<8x64xbf16>
    %c0_8 = arith.constant 0 : index
    %c0_9 = arith.constant 0 : index
    %8 = vector.load %arg6[%c0_8, %c0_9] : memref<64x128xbf16, #tpu.memory_space<vmem>>, vector<64x128xbf16>
    %cst_10 = arith.constant dense<0.000000e+00> : vector<8x128xf32>
    %9 = tpu.matmul %7, %8, %cst_10 {dimension_numbers = #tpu.dot_dimension_numbers<[1], [0], [0], [1], [0, 0, 1, 1], [], []>} : vector<8x64xbf16>, vector<64x128xbf16>, vector<8x128xf32> -> vector<8x128xf32>
    %10 = math.tanh %9 : vector<8x128xf32>
    %cst_11 = arith.constant 1.000000e+00 : f32
    %11 = vector.broadcast %cst_11 : f32 to vector<8x128xf32>
    %12 = arith.mulf %10, %11 : vector<8x128xf32>
    %13 = arith.mulf %12, %12 : vector<8x128xf32>
    %cst_12 = arith.constant dense<0.000000e+00> : vector<8xf32>
    %14 = vector.multi_reduction <add>, %13, %cst_12 [1] : vector<8x128xf32> to vector<8xf32>
    %15 = vector.shape_cast %14 : vector<8xf32> to vector<8x1xf32>
    %cst_13 = arith.constant 2.500000e-01 : f32
    %16 = vector.broadcast %cst_13 : f32 to vector<8x1xf32>
    %17 = arith.mulf %15, %16 : vector<8x1xf32>
    %cst_14 = arith.constant 9.99999997E-7 : f32
    %18 = vector.broadcast %cst_14 : f32 to vector<8x1xf32>
    %19 = arith.addf %17, %18 : vector<8x1xf32>
    %20 = math.rsqrt %19 : vector<8x1xf32>
    %21 = vector.broadcast %20 : vector<8x1xf32> to vector<8x128xf32>
    %22 = arith.mulf %12, %21 : vector<8x128xf32>
    %c0_15 = arith.constant 0 : index
    %c0_16 = arith.constant 0 : index
    %23 = vector.load %arg3[%c0_15, %c0_16] : memref<8x128xf32, #tpu.memory_space<vmem>>, vector<8x128xf32>
    %cst_17 = arith.constant 1.000000e+00 : f32
    %24 = vector.broadcast %cst_17 : f32 to vector<8x128xf32>
    %25 = arith.mulf %23, %24 : vector<8x128xf32>
    %26 = arith.addf %22, %25 : vector<8x128xf32>
    %c0_18 = arith.constant 0 : index
    %c0_19 = arith.constant 0 : index
    %27 = vector.load %arg7[%c0_18, %c0_19] : memref<8x128xf32, #tpu.memory_space<vmem>>, vector<8x128xf32>
    tpu.vector_store %arg7[%c0_18, %c0_19], %26 {strides = array<i32>} : memref<8x128xf32, #tpu.memory_space<vmem>>, vector<8x128xf32>,
    return
  }
  func.func @transform_0(%arg0: i32) -> (i32, i32) {
    %c0_i32 = arith.constant 0 : i32
    %c0_i32_0 = arith.constant 0 : i32
    return %arg0, %c0_i32 : i32, i32
  }
  func.func @transform_1(%arg0: i32) -> (i32, i32) {
    %c0_i32 = arith.constant 0 : i32
    %c0_i32_0 = arith.constant 0 : i32
    return %arg0, %c0_i32 : i32, i32
  }
  func.func @transform_2(%arg0: i32) -> (i32, i32) {
    %c0_i32 = arith.constant 0 : i32
    %c0_i32_0 = arith.constant 0 : i32
    return %arg0, %c0_i32 : i32, i32
  }
  func.func @transform_3(%arg0: i32) -> (i32, i32) {
    %c0_i32 = arith.constant 0 : i32
    %c0_i32_0 = arith.constant 0 : i32
    %c0_i32_1 = arith.constant 0 : i32
    return %c0_i32, %c0_i32_0 : i32, i32
  }
  func.func @transform_4(%arg0: i32) -> (i32, i32) {
    %c0_i32 = arith.constant 0 : i32
    %c0_i32_0 = arith.constant 0 : i32
    %c0_i32_1 = arith.constant 0 : i32
    return %c0_i32, %c0_i32_0 : i32, i32
  }
  func.func @transform_5(%arg0: i32) -> (i32, i32) {
    %c0_i32 = arith.constant 0 : i32
    %c0_i32_0 = arith.constant 0 : i32
    %c0_i32_1 = arith.constant 0 : i32
    return %c0_i32, %c0_i32_0 : i32, i32
  }
  func.func @transform_6(%arg0: i32) -> (i32, i32) {
    %c0_i32 = arith.constant 0 : i32
    %c0_i32_0 = arith.constant 0 : i32
    return %arg0, %c0_i32 : i32, i32
  }
}

module attributes {stable_mosaic.version = 11 : i64} {
  func.func @_scan_kernel(%arg0: i32, %arg1: i32, %arg2: memref<8x2x8x8xf32, #tpu.memory_space<vmem>>, %arg3: memref<8x2x8x8xf32, #tpu.memory_space<vmem>>, %arg4: memref<8x2x8xf32, #tpu.memory_space<vmem>>, %arg5: memref<8x2x8xf32, #tpu.memory_space<vmem>>, %arg6: memref<2x8xf32, #tpu.memory_space<vmem>>, %arg7: memref<2x8xf32, #tpu.memory_space<vmem>>) attributes {dimension_semantics = [#tpu.dimension_semantics<parallel>, #tpu.dimension_semantics<arbitrary>], iteration_bounds = array<i64: 1, 1>, scalar_prefetch = 0 : i64, scratch_operands = 2 : i64, tpu.core_type = #tpu.core_type<tc>, window_params = [{transform_indices = @transform_0, window_bounds = array<i64: 8, 2, 8, 8>}, {transform_indices = @transform_1, window_bounds = array<i64: 8, 2, 8, 8>}, {transform_indices = @transform_2, window_bounds = array<i64: 8, 2, 8>}, {transform_indices = @transform_3, window_bounds = array<i64: 8, 2, 8>}]} {
    %c0_i32 = arith.constant 0 : i32
    %0 = arith.cmpi eq, %arg1, %c0_i32 : i32
    %1 = arith.extui %0 : i1 to i32
    %c0_i32_0 = arith.constant 0 : i32
    %2 = arith.cmpi ne, %1, %c0_i32_0 : i32
    scf.if %2 {
      %cst_128 = arith.constant 0.353553385 : f32
      %151 = vector.broadcast %cst_128 : f32 to vector<2x8xf32>
      %c0_129 = arith.constant 0 : index
      %c0_130 = arith.constant 0 : index
      %152 = vector.load %arg6[%c0_129, %c0_130] : memref<2x8xf32, #tpu.memory_space<vmem>>, vector<2x8xf32>
      tpu.vector_store %arg6[%c0_129, %c0_130], %151 {strides = array<i32>} : memref<2x8xf32, #tpu.memory_space<vmem>>, vector<2x8xf32>,
      %c0_131 = arith.constant 0 : index
      %c0_132 = arith.constant 0 : index
      %153 = vector.load %arg7[%c0_131, %c0_132] : memref<2x8xf32, #tpu.memory_space<vmem>>, vector<2x8xf32>
      tpu.vector_store %arg7[%c0_131, %c0_132], %151 {strides = array<i32>} : memref<2x8xf32, #tpu.memory_space<vmem>>, vector<2x8xf32>,
    } else {
    }
    %c0 = arith.constant 0 : index
    %c0_1 = arith.constant 0 : index
    %3 = vector.load %arg6[%c0, %c0_1] : memref<2x8xf32, #tpu.memory_space<vmem>>, vector<2x8xf32>
    %c0_2 = arith.constant 0 : index
    %c0_3 = arith.constant 0 : index
    %4 = vector.load %arg7[%c0_2, %c0_3] : memref<2x8xf32, #tpu.memory_space<vmem>>, vector<2x8xf32>
    %c0_4 = arith.constant 0 : index
    %c0_5 = arith.constant 0 : index
    %c0_6 = arith.constant 0 : index
    %5 = vector.load %arg4[%c0_4, %c0_5, %c0_6] : memref<8x2x8xf32, #tpu.memory_space<vmem>>, vector<1x2x8xf32>
    %6 = vector.shape_cast %5 : vector<1x2x8xf32> to vector<2x8xf32>
    %7 = vector.shape_cast %3 : vector<2x8xf32> to vector<1x2x8xf32>
    tpu.vector_store %arg4[%c0_4, %c0_5, %c0_6], %7 {strides = array<i32>} : memref<8x2x8xf32, #tpu.memory_space<vmem>>, vector<1x2x8xf32>,
    %8 = vector.shape_cast %3 : vector<2x8xf32> to vector<2x8x1xf32>
    %c0_7 = arith.constant 0 : index
    %c0_8 = arith.constant 0 : index
    %c0_9 = arith.constant 0 : index
    %c0_10 = arith.constant 0 : index
    %9 = vector.load %arg2[%c0_7, %c0_8, %c0_9, %c0_10] : memref<8x2x8x8xf32, #tpu.memory_space<vmem>>, vector<1x2x8x8xf32>
    %10 = vector.shape_cast %9 : vector<1x2x8x8xf32> to vector<2x8x8xf32>
    %11 = vector.broadcast %8 : vector<2x8x1xf32> to vector<2x8x8xf32>
    %12 = arith.mulf %11, %10 : vector<2x8x8xf32>
    %cst = arith.constant dense<0.000000e+00> : vector<2x8xf32>
    %13 = vector.multi_reduction <add>, %12, %cst [1] : vector<2x8x8xf32> to vector<2x8xf32>
    %c7 = arith.constant 7 : index
    %c0_11 = arith.constant 0 : index
    %c0_12 = arith.constant 0 : index
    %14 = vector.load %arg5[%c7, %c0_11, %c0_12] : memref<8x2x8xf32, #tpu.memory_space<vmem>>, vector<1x2x8xf32>
    %15 = vector.shape_cast %14 : vector<1x2x8xf32> to vector<2x8xf32>
    %16 = vector.shape_cast %4 : vector<2x8xf32> to vector<1x2x8xf32>
    tpu.vector_store %arg5[%c7, %c0_11, %c0_12], %16 {strides = array<i32>} : memref<8x2x8xf32, #tpu.memory_space<vmem>>, vector<1x2x8xf32>,
    %17 = vector.shape_cast %4 : vector<2x8xf32> to vector<2x8x1xf32>
    %c7_13 = arith.constant 7 : index
    %c0_14 = arith.constant 0 : index
    %c0_15 = arith.constant 0 : index
    %c0_16 = arith.constant 0 : index
    %18 = vector.load %arg3[%c7_13, %c0_14, %c0_15, %c0_16] : memref<8x2x8x8xf32, #tpu.memory_space<vmem>>, vector<1x2x8x8xf32>
    %19 = vector.shape_cast %18 : vector<1x2x8x8xf32> to vector<2x8x8xf32>
    %20 = vector.broadcast %17 : vector<2x8x1xf32> to vector<2x8x8xf32>
    %21 = arith.mulf %20, %19 : vector<2x8x8xf32>
    %cst_17 = arith.constant dense<0.000000e+00> : vector<2x8xf32>
    %22 = vector.multi_reduction <add>, %21, %cst_17 [1] : vector<2x8x8xf32> to vector<2x8xf32>
    %c1 = arith.constant 1 : index
    %c0_18 = arith.constant 0 : index
    %c0_19 = arith.constant 0 : index
    %23 = vector.load %arg4[%c1, %c0_18, %c0_19] : memref<8x2x8xf32, #tpu.memory_space<vmem>>, vector<1x2x8xf32>
    %24 = vector.shape_cast %23 : vector<1x2x8xf32> to vector<2x8xf32>
    %25 = vector.shape_cast %13 : vector<2x8xf32> to vector<1x2x8xf32>
    tpu.vector_store %arg4[%c1, %c0_18, %c0_19], %25 {strides = array<i32>} : memref<8x2x8xf32, #tpu.memory_space<vmem>>, vector<1x2x8xf32>,
    %26 = vector.shape_cast %13 : vector<2x8xf32> to vector<2x8x1xf32>
    %c1_20 = arith.constant 1 : index
    %c0_21 = arith.constant 0 : index
    %c0_22 = arith.constant 0 : index
    %c0_23 = arith.constant 0 : index
    %27 = vector.load %arg2[%c1_20, %c0_21, %c0_22, %c0_23] : memref<8x2x8x8xf32, #tpu.memory_space<vmem>>, vector<1x2x8x8xf32>
    %28 = vector.shape_cast %27 : vector<1x2x8x8xf32> to vector<2x8x8xf32>
    %29 = vector.broadcast %26 : vector<2x8x1xf32> to vector<2x8x8xf32>
    %30 = arith.mulf %29, %28 : vector<2x8x8xf32>
    %cst_24 = arith.constant dense<0.000000e+00> : vector<2x8xf32>
    %31 = vector.multi_reduction <add>, %30, %cst_24 [1] : vector<2x8x8xf32> to vector<2x8xf32>
    %c6 = arith.constant 6 : index
    %c0_25 = arith.constant 0 : index
    %c0_26 = arith.constant 0 : index
    %32 = vector.load %arg5[%c6, %c0_25, %c0_26] : memref<8x2x8xf32, #tpu.memory_space<vmem>>, vector<1x2x8xf32>
    %33 = vector.shape_cast %32 : vector<1x2x8xf32> to vector<2x8xf32>
    %34 = vector.shape_cast %22 : vector<2x8xf32> to vector<1x2x8xf32>
    tpu.vector_store %arg5[%c6, %c0_25, %c0_26], %34 {strides = array<i32>} : memref<8x2x8xf32, #tpu.memory_space<vmem>>, vector<1x2x8xf32>,
    %35 = vector.shape_cast %22 : vector<2x8xf32> to vector<2x8x1xf32>
    %c6_27 = arith.constant 6 : index
    %c0_28 = arith.constant 0 : index
    %c0_29 = arith.constant 0 : index
    %c0_30 = arith.constant 0 : index
    %36 = vector.load %arg3[%c6_27, %c0_28, %c0_29, %c0_30] : memref<8x2x8x8xf32, #tpu.memory_space<vmem>>, vector<1x2x8x8xf32>
    %37 = vector.shape_cast %36 : vector<1x2x8x8xf32> to vector<2x8x8xf32>
    %38 = vector.broadcast %35 : vector<2x8x1xf32> to vector<2x8x8xf32>
    %39 = arith.mulf %38, %37 : vector<2x8x8xf32>
    %cst_31 = arith.constant dense<0.000000e+00> : vector<2x8xf32>
    %40 = vector.multi_reduction <add>, %39, %cst_31 [1] : vector<2x8x8xf32> to vector<2x8xf32>
    %c2 = arith.constant 2 : index
    %c0_32 = arith.constant 0 : index
    %c0_33 = arith.constant 0 : index
    %41 = vector.load %arg4[%c2, %c0_32, %c0_33] : memref<8x2x8xf32, #tpu.memory_space<vmem>>, vector<1x2x8xf32>
    %42 = vector.shape_cast %41 : vector<1x2x8xf32> to vector<2x8xf32>
    %43 = vector.shape_cast %31 : vector<2x8xf32> to vector<1x2x8xf32>
    tpu.vector_store %arg4[%c2, %c0_32, %c0_33], %43 {strides = array<i32>} : memref<8x2x8xf32, #tpu.memory_space<vmem>>, vector<1x2x8xf32>,
    %44 = vector.shape_cast %31 : vector<2x8xf32> to vector<2x8x1xf32>
    %c2_34 = arith.constant 2 : index
    %c0_35 = arith.constant 0 : index
    %c0_36 = arith.constant 0 : index
    %c0_37 = arith.constant 0 : index
    %45 = vector.load %arg2[%c2_34, %c0_35, %c0_36, %c0_37] : memref<8x2x8x8xf32, #tpu.memory_space<vmem>>, vector<1x2x8x8xf32>
    %46 = vector.shape_cast %45 : vector<1x2x8x8xf32> to vector<2x8x8xf32>
    %47 = vector.broadcast %44 : vector<2x8x1xf32> to vector<2x8x8xf32>
    %48 = arith.mulf %47, %46 : vector<2x8x8xf32>
    %cst_38 = arith.constant dense<0.000000e+00> : vector<2x8xf32>
    %49 = vector.multi_reduction <add>, %48, %cst_38 [1] : vector<2x8x8xf32> to vector<2x8xf32>
    %c5 = arith.constant 5 : index
    %c0_39 = arith.constant 0 : index
    %c0_40 = arith.constant 0 : index
    %50 = vector.load %arg5[%c5, %c0_39, %c0_40] : memref<8x2x8xf32, #tpu.memory_space<vmem>>, vector<1x2x8xf32>
    %51 = vector.shape_cast %50 : vector<1x2x8xf32> to vector<2x8xf32>
    %52 = vector.shape_cast %40 : vector<2x8xf32> to vector<1x2x8xf32>
    tpu.vector_store %arg5[%c5, %c0_39, %c0_40], %52 {strides = array<i32>} : memref<8x2x8xf32, #tpu.memory_space<vmem>>, vector<1x2x8xf32>,
    %53 = vector.shape_cast %40 : vector<2x8xf32> to vector<2x8x1xf32>
    %c5_41 = arith.constant 5 : index
    %c0_42 = arith.constant 0 : index
    %c0_43 = arith.constant 0 : index
    %c0_44 = arith.constant 0 : index
    %54 = vector.load %arg3[%c5_41, %c0_42, %c0_43, %c0_44] : memref<8x2x8x8xf32, #tpu.memory_space<vmem>>, vector<1x2x8x8xf32>
    %55 = vector.shape_cast %54 : vector<1x2x8x8xf32> to vector<2x8x8xf32>
    %56 = vector.broadcast %53 : vector<2x8x1xf32> to vector<2x8x8xf32>
    %57 = arith.mulf %56, %55 : vector<2x8x8xf32>
    %cst_45 = arith.constant dense<0.000000e+00> : vector<2x8xf32>
    %58 = vector.multi_reduction <add>, %57, %cst_45 [1] : vector<2x8x8xf32> to vector<2x8xf32>
    %c3 = arith.constant 3 : index
    %c0_46 = arith.constant 0 : index
    %c0_47 = arith.constant 0 : index
    %59 = vector.load %arg4[%c3, %c0_46, %c0_47] : memref<8x2x8xf32, #tpu.memory_space<vmem>>, vector<1x2x8xf32>
    %60 = vector.shape_cast %59 : vector<1x2x8xf32> to vector<2x8xf32>
    %61 = vector.shape_cast %49 : vector<2x8xf32> to vector<1x2x8xf32>
    tpu.vector_store %arg4[%c3, %c0_46, %c0_47], %61 {strides = array<i32>} : memref<8x2x8xf32, #tpu.memory_space<vmem>>, vector<1x2x8xf32>,
    %62 = vector.shape_cast %49 : vector<2x8xf32> to vector<2x8x1xf32>
    %c3_48 = arith.constant 3 : index
    %c0_49 = arith.constant 0 : index
    %c0_50 = arith.constant 0 : index
    %c0_51 = arith.constant 0 : index
    %63 = vector.load %arg2[%c3_48, %c0_49, %c0_50, %c0_51] : memref<8x2x8x8xf32, #tpu.memory_space<vmem>>, vector<1x2x8x8xf32>
    %64 = vector.shape_cast %63 : vector<1x2x8x8xf32> to vector<2x8x8xf32>
    %65 = vector.broadcast %62 : vector<2x8x1xf32> to vector<2x8x8xf32>
    %66 = arith.mulf %65, %64 : vector<2x8x8xf32>
    %cst_52 = arith.constant dense<0.000000e+00> : vector<2x8xf32>
    %67 = vector.multi_reduction <add>, %66, %cst_52 [1] : vector<2x8x8xf32> to vector<2x8xf32>
    %c4 = arith.constant 4 : index
    %c0_53 = arith.constant 0 : index
    %c0_54 = arith.constant 0 : index
    %68 = vector.load %arg5[%c4, %c0_53, %c0_54] : memref<8x2x8xf32, #tpu.memory_space<vmem>>, vector<1x2x8xf32>
    %69 = vector.shape_cast %68 : vector<1x2x8xf32> to vector<2x8xf32>
    %70 = vector.shape_cast %58 : vector<2x8xf32> to vector<1x2x8xf32>
    tpu.vector_store %arg5[%c4, %c0_53, %c0_54], %70 {strides = array<i32>} : memref<8x2x8xf32, #tpu.memory_space<vmem>>, vector<1x2x8xf32>,
    %71 = vector.shape_cast %58 : vector<2x8xf32> to vector<2x8x1xf32>
    %c4_55 = arith.constant 4 : index
    %c0_56 = arith.constant 0 : index
    %c0_57 = arith.constant 0 : index
    %c0_58 = arith.constant 0 : index
    %72 = vector.load %arg3[%c4_55, %c0_56, %c0_57, %c0_58] : memref<8x2x8x8xf32, #tpu.memory_space<vmem>>, vector<1x2x8x8xf32>
    %73 = vector.shape_cast %72 : vector<1x2x8x8xf32> to vector<2x8x8xf32>
    %74 = vector.broadcast %71 : vector<2x8x1xf32> to vector<2x8x8xf32>
    %75 = arith.mulf %74, %73 : vector<2x8x8xf32>
    %cst_59 = arith.constant dense<0.000000e+00> : vector<2x8xf32>
    %76 = vector.multi_reduction <add>, %75, %cst_59 [1] : vector<2x8x8xf32> to vector<2x8xf32>
    %c4_60 = arith.constant 4 : index
    %c0_61 = arith.constant 0 : index
    %c0_62 = arith.constant 0 : index
    %77 = vector.load %arg4[%c4_60, %c0_61, %c0_62] : memref<8x2x8xf32, #tpu.memory_space<vmem>>, vector<1x2x8xf32>
    %78 = vector.shape_cast %77 : vector<1x2x8xf32> to vector<2x8xf32>
    %79 = vector.shape_cast %67 : vector<2x8xf32> to vector<1x2x8xf32>
    tpu.vector_store %arg4[%c4_60, %c0_61, %c0_62], %79 {strides = array<i32>} : memref<8x2x8xf32, #tpu.memory_space<vmem>>, vector<1x2x8xf32>,
    %80 = vector.shape_cast %67 : vector<2x8xf32> to vector<2x8x1xf32>
    %c4_63 = arith.constant 4 : index
    %c0_64 = arith.constant 0 : index
    %c0_65 = arith.constant 0 : index
    %c0_66 = arith.constant 0 : index
    %81 = vector.load %arg2[%c4_63, %c0_64, %c0_65, %c0_66] : memref<8x2x8x8xf32, #tpu.memory_space<vmem>>, vector<1x2x8x8xf32>
    %82 = vector.shape_cast %81 : vector<1x2x8x8xf32> to vector<2x8x8xf32>
    %83 = vector.broadcast %80 : vector<2x8x1xf32> to vector<2x8x8xf32>
    %84 = arith.mulf %83, %82 : vector<2x8x8xf32>
    %cst_67 = arith.constant dense<0.000000e+00> : vector<2x8xf32>
    %85 = vector.multi_reduction <add>, %84, %cst_67 [1] : vector<2x8x8xf32> to vector<2x8xf32>
    %c3_68 = arith.constant 3 : index
    %c0_69 = arith.constant 0 : index
    %c0_70 = arith.constant 0 : index
    %86 = vector.load %arg5[%c3_68, %c0_69, %c0_70] : memref<8x2x8xf32, #tpu.memory_space<vmem>>, vector<1x2x8xf32>
    %87 = vector.shape_cast %86 : vector<1x2x8xf32> to vector<2x8xf32>
    %88 = vector.shape_cast %76 : vector<2x8xf32> to vector<1x2x8xf32>
    tpu.vector_store %arg5[%c3_68, %c0_69, %c0_70], %88 {strides = array<i32>} : memref<8x2x8xf32, #tpu.memory_space<vmem>>, vector<1x2x8xf32>,
    %89 = vector.shape_cast %76 : vector<2x8xf32> to vector<2x8x1xf32>
    %c3_71 = arith.constant 3 : index
    %c0_72 = arith.constant 0 : index
    %c0_73 = arith.constant 0 : index
    %c0_74 = arith.constant 0 : index
    %90 = vector.load %arg3[%c3_71, %c0_72, %c0_73, %c0_74] : memref<8x2x8x8xf32, #tpu.memory_space<vmem>>, vector<1x2x8x8xf32>
    %91 = vector.shape_cast %90 : vector<1x2x8x8xf32> to vector<2x8x8xf32>
    %92 = vector.broadcast %89 : vector<2x8x1xf32> to vector<2x8x8xf32>
    %93 = arith.mulf %92, %91 : vector<2x8x8xf32>
    %cst_75 = arith.constant dense<0.000000e+00> : vector<2x8xf32>
    %94 = vector.multi_reduction <add>, %93, %cst_75 [1] : vector<2x8x8xf32> to vector<2x8xf32>
    %c5_76 = arith.constant 5 : index
    %c0_77 = arith.constant 0 : index
    %c0_78 = arith.constant 0 : index
    %95 = vector.load %arg4[%c5_76, %c0_77, %c0_78] : memref<8x2x8xf32, #tpu.memory_space<vmem>>, vector<1x2x8xf32>
    %96 = vector.shape_cast %95 : vector<1x2x8xf32> to vector<2x8xf32>
    %97 = vector.shape_cast %85 : vector<2x8xf32> to vector<1x2x8xf32>
    tpu.vector_store %arg4[%c5_76, %c0_77, %c0_78], %97 {strides = array<i32>} : memref<8x2x8xf32, #tpu.memory_space<vmem>>, vector<1x2x8xf32>,
    %98 = vector.shape_cast %85 : vector<2x8xf32> to vector<2x8x1xf32>
    %c5_79 = arith.constant 5 : index
    %c0_80 = arith.constant 0 : index
    %c0_81 = arith.constant 0 : index
    %c0_82 = arith.constant 0 : index
    %99 = vector.load %arg2[%c5_79, %c0_80, %c0_81, %c0_82] : memref<8x2x8x8xf32, #tpu.memory_space<vmem>>, vector<1x2x8x8xf32>
    %100 = vector.shape_cast %99 : vector<1x2x8x8xf32> to vector<2x8x8xf32>
    %101 = vector.broadcast %98 : vector<2x8x1xf32> to vector<2x8x8xf32>
    %102 = arith.mulf %101, %100 : vector<2x8x8xf32>
    %cst_83 = arith.constant dense<0.000000e+00> : vector<2x8xf32>
    %103 = vector.multi_reduction <add>, %102, %cst_83 [1] : vector<2x8x8xf32> to vector<2x8xf32>
    %c2_84 = arith.constant 2 : index
    %c0_85 = arith.constant 0 : index
    %c0_86 = arith.constant 0 : index
    %104 = vector.load %arg5[%c2_84, %c0_85, %c0_86] : memref<8x2x8xf32, #tpu.memory_space<vmem>>, vector<1x2x8xf32>
    %105 = vector.shape_cast %104 : vector<1x2x8xf32> to vector<2x8xf32>
    %106 = vector.shape_cast %94 : vector<2x8xf32> to vector<1x2x8xf32>
    tpu.vector_store %arg5[%c2_84, %c0_85, %c0_86], %106 {strides = array<i32>} : memref<8x2x8xf32, #tpu.memory_space<vmem>>, vector<1x2x8xf32>,
    %107 = vector.shape_cast %94 : vector<2x8xf32> to vector<2x8x1xf32>
    %c2_87 = arith.constant 2 : index
    %c0_88 = arith.constant 0 : index
    %c0_89 = arith.constant 0 : index
    %c0_90 = arith.constant 0 : index
    %108 = vector.load %arg3[%c2_87, %c0_88, %c0_89, %c0_90] : memref<8x2x8x8xf32, #tpu.memory_space<vmem>>, vector<1x2x8x8xf32>
    %109 = vector.shape_cast %108 : vector<1x2x8x8xf32> to vector<2x8x8xf32>
    %110 = vector.broadcast %107 : vector<2x8x1xf32> to vector<2x8x8xf32>
    %111 = arith.mulf %110, %109 : vector<2x8x8xf32>
    %cst_91 = arith.constant dense<0.000000e+00> : vector<2x8xf32>
    %112 = vector.multi_reduction <add>, %111, %cst_91 [1] : vector<2x8x8xf32> to vector<2x8xf32>
    %c6_92 = arith.constant 6 : index
    %c0_93 = arith.constant 0 : index
    %c0_94 = arith.constant 0 : index
    %113 = vector.load %arg4[%c6_92, %c0_93, %c0_94] : memref<8x2x8xf32, #tpu.memory_space<vmem>>, vector<1x2x8xf32>
    %114 = vector.shape_cast %113 : vector<1x2x8xf32> to vector<2x8xf32>
    %115 = vector.shape_cast %103 : vector<2x8xf32> to vector<1x2x8xf32>
    tpu.vector_store %arg4[%c6_92, %c0_93, %c0_94], %115 {strides = array<i32>} : memref<8x2x8xf32, #tpu.memory_space<vmem>>, vector<1x2x8xf32>,
    %116 = vector.shape_cast %103 : vector<2x8xf32> to vector<2x8x1xf32>
    %c6_95 = arith.constant 6 : index
    %c0_96 = arith.constant 0 : index
    %c0_97 = arith.constant 0 : index
    %c0_98 = arith.constant 0 : index
    %117 = vector.load %arg2[%c6_95, %c0_96, %c0_97, %c0_98] : memref<8x2x8x8xf32, #tpu.memory_space<vmem>>, vector<1x2x8x8xf32>
    %118 = vector.shape_cast %117 : vector<1x2x8x8xf32> to vector<2x8x8xf32>
    %119 = vector.broadcast %116 : vector<2x8x1xf32> to vector<2x8x8xf32>
    %120 = arith.mulf %119, %118 : vector<2x8x8xf32>
    %cst_99 = arith.constant dense<0.000000e+00> : vector<2x8xf32>
    %121 = vector.multi_reduction <add>, %120, %cst_99 [1] : vector<2x8x8xf32> to vector<2x8xf32>
    %c1_100 = arith.constant 1 : index
    %c0_101 = arith.constant 0 : index
    %c0_102 = arith.constant 0 : index
    %122 = vector.load %arg5[%c1_100, %c0_101, %c0_102] : memref<8x2x8xf32, #tpu.memory_space<vmem>>, vector<1x2x8xf32>
    %123 = vector.shape_cast %122 : vector<1x2x8xf32> to vector<2x8xf32>
    %124 = vector.shape_cast %112 : vector<2x8xf32> to vector<1x2x8xf32>
    tpu.vector_store %arg5[%c1_100, %c0_101, %c0_102], %124 {strides = array<i32>} : memref<8x2x8xf32, #tpu.memory_space<vmem>>, vector<1x2x8xf32>,
    %125 = vector.shape_cast %112 : vector<2x8xf32> to vector<2x8x1xf32>
    %c1_103 = arith.constant 1 : index
    %c0_104 = arith.constant 0 : index
    %c0_105 = arith.constant 0 : index
    %c0_106 = arith.constant 0 : index
    %126 = vector.load %arg3[%c1_103, %c0_104, %c0_105, %c0_106] : memref<8x2x8x8xf32, #tpu.memory_space<vmem>>, vector<1x2x8x8xf32>
    %127 = vector.shape_cast %126 : vector<1x2x8x8xf32> to vector<2x8x8xf32>
    %128 = vector.broadcast %125 : vector<2x8x1xf32> to vector<2x8x8xf32>
    %129 = arith.mulf %128, %127 : vector<2x8x8xf32>
    %cst_107 = arith.constant dense<0.000000e+00> : vector<2x8xf32>
    %130 = vector.multi_reduction <add>, %129, %cst_107 [1] : vector<2x8x8xf32> to vector<2x8xf32>
    %c7_108 = arith.constant 7 : index
    %c0_109 = arith.constant 0 : index
    %c0_110 = arith.constant 0 : index
    %131 = vector.load %arg4[%c7_108, %c0_109, %c0_110] : memref<8x2x8xf32, #tpu.memory_space<vmem>>, vector<1x2x8xf32>
    %132 = vector.shape_cast %131 : vector<1x2x8xf32> to vector<2x8xf32>
    %133 = vector.shape_cast %121 : vector<2x8xf32> to vector<1x2x8xf32>
    tpu.vector_store %arg4[%c7_108, %c0_109, %c0_110], %133 {strides = array<i32>} : memref<8x2x8xf32, #tpu.memory_space<vmem>>, vector<1x2x8xf32>,
    %134 = vector.shape_cast %121 : vector<2x8xf32> to vector<2x8x1xf32>
    %c7_111 = arith.constant 7 : index
    %c0_112 = arith.constant 0 : index
    %c0_113 = arith.constant 0 : index
    %c0_114 = arith.constant 0 : index
    %135 = vector.load %arg2[%c7_111, %c0_112, %c0_113, %c0_114] : memref<8x2x8x8xf32, #tpu.memory_space<vmem>>, vector<1x2x8x8xf32>
    %136 = vector.shape_cast %135 : vector<1x2x8x8xf32> to vector<2x8x8xf32>
    %137 = vector.broadcast %134 : vector<2x8x1xf32> to vector<2x8x8xf32>
    %138 = arith.mulf %137, %136 : vector<2x8x8xf32>
    %cst_115 = arith.constant dense<0.000000e+00> : vector<2x8xf32>
    %139 = vector.multi_reduction <add>, %138, %cst_115 [1] : vector<2x8x8xf32> to vector<2x8xf32>
    %c0_116 = arith.constant 0 : index
    %c0_117 = arith.constant 0 : index
    %c0_118 = arith.constant 0 : index
    %140 = vector.load %arg5[%c0_116, %c0_117, %c0_118] : memref<8x2x8xf32, #tpu.memory_space<vmem>>, vector<1x2x8xf32>
    %141 = vector.shape_cast %140 : vector<1x2x8xf32> to vector<2x8xf32>
    %142 = vector.shape_cast %130 : vector<2x8xf32> to vector<1x2x8xf32>
    tpu.vector_store %arg5[%c0_116, %c0_117, %c0_118], %142 {strides = array<i32>} : memref<8x2x8xf32, #tpu.memory_space<vmem>>, vector<1x2x8xf32>,
    %143 = vector.shape_cast %130 : vector<2x8xf32> to vector<2x8x1xf32>
    %c0_119 = arith.constant 0 : index
    %c0_120 = arith.constant 0 : index
    %c0_121 = arith.constant 0 : index
    %c0_122 = arith.constant 0 : index
    %144 = vector.load %arg3[%c0_119, %c0_120, %c0_121, %c0_122] : memref<8x2x8x8xf32, #tpu.memory_space<vmem>>, vector<1x2x8x8xf32>
    %145 = vector.shape_cast %144 : vector<1x2x8x8xf32> to vector<2x8x8xf32>
    %146 = vector.broadcast %143 : vector<2x8x1xf32> to vector<2x8x8xf32>
    %147 = arith.mulf %146, %145 : vector<2x8x8xf32>
    %cst_123 = arith.constant dense<0.000000e+00> : vector<2x8xf32>
    %148 = vector.multi_reduction <add>, %147, %cst_123 [1] : vector<2x8x8xf32> to vector<2x8xf32>
    %c0_124 = arith.constant 0 : index
    %c0_125 = arith.constant 0 : index
    %149 = vector.load %arg6[%c0_124, %c0_125] : memref<2x8xf32, #tpu.memory_space<vmem>>, vector<2x8xf32>
    tpu.vector_store %arg6[%c0_124, %c0_125], %139 {strides = array<i32>} : memref<2x8xf32, #tpu.memory_space<vmem>>, vector<2x8xf32>,
    %c0_126 = arith.constant 0 : index
    %c0_127 = arith.constant 0 : index
    %150 = vector.load %arg7[%c0_126, %c0_127] : memref<2x8xf32, #tpu.memory_space<vmem>>, vector<2x8xf32>
    tpu.vector_store %arg7[%c0_126, %c0_127], %148 {strides = array<i32>} : memref<2x8xf32, #tpu.memory_space<vmem>>, vector<2x8xf32>,
    return
  }
  func.func @transform_0(%arg0: i32, %arg1: i32) -> (i32, i32, i32, i32) {
    %c0_i32 = arith.constant 0 : i32
    %c0_i32_0 = arith.constant 0 : i32
    %c0_i32_1 = arith.constant 0 : i32
    return %arg1, %arg0, %c0_i32, %c0_i32_0 : i32, i32, i32, i32
  }
  func.func @transform_1(%arg0: i32, %arg1: i32) -> (i32, i32, i32, i32) {
    %c0_i32 = arith.constant 0 : i32
    %0 = arith.subi %c0_i32, %arg1 : i32
    %c1_i32 = arith.constant 1 : i32
    %c0_i32_0 = arith.constant 0 : i32
    %c0_i32_1 = arith.constant 0 : i32
    return %0, %arg0, %c1_i32, %c0_i32_0 : i32, i32, i32, i32
  }
  func.func @transform_2(%arg0: i32, %arg1: i32) -> (i32, i32, i32) {
    %c0_i32 = arith.constant 0 : i32
    %c0_i32_0 = arith.constant 0 : i32
    return %arg1, %arg0, %c0_i32 : i32, i32, i32
  }
  func.func @transform_3(%arg0: i32, %arg1: i32) -> (i32, i32, i32) {
    %c0_i32 = arith.constant 0 : i32
    %0 = arith.subi %c0_i32, %arg1 : i32
    %c0_i32_0 = arith.constant 0 : i32
    %c0_i32_1 = arith.constant 0 : i32
    return %0, %arg0, %c0_i32_0 : i32, i32, i32
  }
}

</mosaic_0001>

<bundles_post_ra>
// kernel: _lambda_.12
= control target key start
LH: loop header
LB: loop body
LE: loop exit
PB: predicated region body
PF: predicated region fallthrough
CT: control target
= control target key end

     0   :  { %s352_s9 = smov 0   ;;  %s393_s0 = inlined_call_operand.vmem [shape: f32[16,128], index: 0, kind: input, shape index: {}]   ;;  %s394_s1 = inlined_call_operand.vmem [shape: bf16[128,128], index: 1, kind: input, shape index: {}]   ;;  %s395_s2 = inlined_call_operand.vmem [shape: f32[16,128], index: 2, kind: output, shape index: {}]  }
   0x1 LB: > { %s272_s10 = sadd.s32 4294967295, %s335_s9   ;;  %p276_p0 = scmp.ge.s32.totalorder %s335_s9, 1  ;;  %s335_s9 = sphi %s352_s9, %s12_s9  }
   0x2   : > { %p111_p1 = scmp.lt.s32.totalorder %s335_s9, 3 }
   0x4   : > { %p112_p2 = pnand %p276_p0, %p111_p1 }
   0x5   : > { %p131_p3 = scmp.lt.s32.totalorder (!%p112_p2), %s272_s10, 1 }
   0x6   : > { %115 = sbr.rel (%p112_p2) target bundleno = 177 (0xb1), region = 28 }
   0xb   : > { %v320_v0 = vld [vmem:[%s394_s1 + $0x38] sm:$0xff]  ;;  %v319_v1 = vld [vmem:[%s394_s1 + $0x30] sm:$0xff]  ;;  %v318_v2 = vld [vmem:[%s394_s1 + $0x28] sm:$0xff]  ;;  %s397_s10 = smov (!%p131_p3, %s272_s10), 1 }
   0xc   : > { %205 = vmatpush.bf16.msra.mxu0 %v320_v0  ;;  %v317_v3 = vld [vmem:[%s394_s1 + $0x20] sm:$0xff]  ;;  %v316_v4 = vld [vmem:[%s394_s1 + $0x18] sm:$0xff]  ;;  %v315_v5 = vld [vmem:[%s394_s1 + $0x10] sm:$0xff]  ;;  %s277_s23 = sshll.u32 %s397_s10, 3 }
   0xd   : > { %v314_v6 = vld [vmem:[%s394_s1 + $0x8] sm:$0xff]  ;;  %s134_s28 = scalar_lea.vmem %s393_s0, %s277_s23  ;;  %v313_v7 = vld [vmem:[%s394_s1] sm:$0xff]  ;;  %s138_s5 = scalar_lea.vmem %s395_s2, %s277_s23 }
   0xe   : > { %v139_v8 = vld [vmem:[%s134_s28] sm:$0xff] }
   0xf   : > { %v140_v9 = vpack.c.bf16 %v139_v8, %v139_v8 }
  0x10   : > { %206 = vmatpush.bf16.msra.mxu0 %v319_v1 }
  0x14   : > { %207 = vmatpush.bf16.msra.mxu0 %v318_v2 }
  0x18   : > { %208 = vmatpush.bf16.msra.mxu0 %v317_v3 }
  0x1c   : > { %209 = vmatpush.bf16.msra.mxu0 %v316_v4 }
  0x20   : > { %210 = vmatpush.bf16.msra.mxu0 %v315_v5 }
  0x24   : > { %211 = vmatpush.bf16.msra.mxu0 %v314_v6 }
  0x28   : > { %212 = vmatpush.bf16.msra.mxu0 %v313_v7 }
  0x2b   : > { %213 = vmatmul.bf16.vlgmr.msra.gmra.mxu0 %v140_v9 }
  0xa8   : > { %v214_v10 = vpop.f32.mrf.mxu0 }
  0xa9   : > { %218 = vst [vmem:[%s138_s5] sm:$0xff] %v214_v10 }
  0xb0   : > { %v216_v11 = vpop.f32.mrf.mxu0 }
  0xb1 PF: > { %s12_s9 = sadd.s32 1, %s335_s9  }
  0xb2   : > { %p9_p4 = scmp.ge.s32.totalorder %s12_s9, 4  }
  0xb4   :  { %11 = sbr.rel (!%p9_p4) target bundleno = 1 (0x1), region = 58 }

// kernel: _lambda_.14
= control target key start
LH: loop header
LB: loop body
LE: loop exit
PB: predicated region body
PF: predicated region fallthrough
CT: control target
= control target key end

     0   :  { %s820_s21 = smov 0   ;;  %s867_s0 = inlined_call_operand.vmem [shape: f32[16,8], index: 0, kind: input, shape index: {}]   ;;  %s868_s1 = inlined_call_operand.vmem [shape: f32[16,8], index: 1, kind: input, shape index: {}]   ;;  %s869_s2 = inlined_call_operand.vmem [shape: f32[16,128], index: 2, kind: input, shape index: {}]   ;;  %s870_s3 = inlined_call_operand.vmem [shape: f32[8,64], index: 3, kind: input, shape index: {}]   ;;  %s871_s4 = inlined_call_operand.vmem [shape: f32[8,64], index: 4, kind: input, shape index: {}]   ;;  %s872_s5 = inlined_call_operand.vmem [shape: bf16[64,128], index: 5, kind: input, shape index: {}]   ;;  %s873_s6 = inlined_call_operand.vmem [shape: f32[16,128], index: 6, kind: output, shape index: {}]  }
   0x1 LB: > { %s733_s22 = sadd.s32 4294967295, %s783_s21   ;;  %p737_p0 = scmp.ge.s32.totalorder %s783_s21, 1  ;;  %s783_s21 = sphi %s820_s21, %s16_s21  }
   0x2   : > { %p229_p1 = scmp.lt.s32.totalorder %s783_s21, 3 }
   0x4   : > { %p230_p2 = pnand %p737_p0, %p229_p1 }
   0x5   : > { %p265_p3 = scmp.lt.s32.totalorder (!%p230_p2), %s733_s22, 1 }
   0x6   : > { %233 = sbr.rel (%p230_p2) target bundleno = 464 (0x1d0), region = 44 }
   0xb   : > { %v283_v0 = vld [vmem:[%s870_s3] sm:$0xff]  ;;  %s875_s22 = smov (!%p265_p3, %s733_s22), 1  ;;  %vm284_vm0 = vcmask 64512   ;;  %v764_v26 = vld [vmem:[%s872_s5 + $0x18] sm:$0xff]  ;;  %v763_v27 = vld [vmem:[%s872_s5 + $0x10] sm:$0xff]  ;;  %vm619_vm1 = vcmask 523264  }
   0xc   : > { %v435_v1 = vld [vmem:[%s871_s4] sm:$0xff]  ;;  %v303_v2 = vand.u32 4294901760, %v283_v0  ;;  %s834_s27 = sshll.u32 %s875_s22, 3  ;;  %v762_v28 = vld [vmem:[%s872_s5 + $0x8] sm:$0xff] }
   0xd   : > { %v454_v3 = vand.u32 4294901760, %v435_v1  ;;  %s268_s30 = scalar_lea.vmem %s867_s0, %s834_s27  ;;  %s272_s9 = scalar_lea.vmem %s868_s1, %s834_s27  ;;  %v761_v29 = vld [vmem:[%s872_s5] sm:$0xff] }
   0xe   : > { %v330_v4 = vsub.f32 %v283_v0, %v303_v2  ;;  %304 = vmatpush.msra.mxu1 %v303_v2  ;;  %380 = vmatpush.msra.mxu3 %v303_v2  ;;  %v282_v8 = vld [vmem:[%s268_s30] sm:$0xff]  ;;  %s276_s20 = scalar_lea.vmem %s869_s2, %s834_s27  ;;  %s280_s24 = scalar_lea.vmem %s873_s6, %s834_s27 }
   0xf   : > { %v481_v5 = vsub.f32 %v435_v1, %v454_v3  ;;  %v434_v9 = vld [vmem:[%s272_s9] sm:$0xff]  ;;  %v286_v10 = vsel %vm284_vm0, %v282_v8, 0 }
  0x10   : > { %357 = vmatpush.msra.mxu2 %v330_v4  ;;  %v331_v6 = vand.u32 4294901760, %v330_v4  ;;  %v437_v11 = vsel %vm284_vm0, %v434_v9, 0  ;;  %v305_v14 = vand.u32 4294901760, %v286_v10 }
  0x11   : > { %v482_v7 = vand.u32 4294901760, %v481_v5  ;;  %508 = vmatpush.msra.mxu0 %v481_v5  ;;  %v456_v15 = vand.u32 4294901760, %v437_v11 }
  0x12   : > { %406 = vmatpush.msrb.mxu2 %v331_v6  ;;  %v332_v12 = vsub.f32 %v330_v4, %v331_v6  ;;  %v306_v18 = vsub.f32 %v286_v10, %v305_v14  ;;  %v653_v4 = vld [vmem:[%s276_s20] sm:$0xff] }
  0x13   : > { %v483_v13 = vsub.f32 %v481_v5, %v482_v7  ;;  %v457_v19 = vsub.f32 %v437_v11, %v456_v15  ;;  %627 = vmatpush.bf16.msrb.mxu0 %v764_v26 }
  0x14   : > { %v333_v16 = vand.u32 4294901760, %v332_v12  ;;  %360 = vmatmul.f32.vlgmr.msra.gmra.mxu2 %v306_v18  ;;  %v307_v20 = vand.u32 4294901760, %v306_v18 }
  0x15   : > { %v484_v17 = vand.u32 4294901760, %v483_v13  ;;  %511 = vmatmul.f32.vlgmr.msra.gmra.mxu0 %v457_v19  ;;  %455 = vmatpush.msra.mxu2 %v454_v3  ;;  %v458_v23 = vand.u32 4294901760, %v457_v19 }
  0x16   : > { %334 = vmatpush.msrb.mxu1 %v333_v16  ;;  %v308_v21 = vsub.f32 %v306_v18, %v307_v20  ;;  %384 = vmatmul.f32.vlgmr.msra.gmra.mxu3 %v307_v20 }
  0x17   : > { %485 = vmatpush.msrb.mxu3 %v484_v17  ;;  %v459_v24 = vsub.f32 %v457_v19, %v458_v23  ;;  %628 = vmatpush.bf16.msrb.mxu0 %v763_v27 }
  0x18   : > { %v309_v22 = vand.u32 4294901760, %v308_v21 }
  0x19   : > { %579 = vmatpush.msra.mxu3 %v454_v3  ;;  %v460_v25 = vand.u32 4294901760, %v459_v24 }
  0x1a   : > { %310 = vmatmul.f32.vlgmr.msra.gmra.mxu1 %v309_v22 }
  0x1b   : > { %428 = vmatpush.msra.mxu1 %v303_v2  ;;  %629 = vmatpush.bf16.msrb.mxu0 %v762_v28 }
  0x1c   : > { %408 = vmatmul.f32.vlgmr.msrb.gmra.mxu2 %v305_v14 }
  0x1d   : > { %557 = vmatpush.msrb.mxu2 %v482_v7 }
  0x1e   : > { %487 = vmatmul.f32.vlgmr.msrb.gmra.mxu3 %v456_v15 }
  0x1f   : > { %630 = vmatpush.bf16.msrb.mxu0 %v761_v29 }
  0x22   : > { %336 = vmatmul.f32.vlgmr.msrb.gmra.mxu1 %v305_v14 }
  0x23   : > { %531 = vmatpush.msrb.mxu1 %v454_v3 }
  0x24   : > { %461 = vmatmul.f32.vlgmr.msra.gmra.mxu2 %v460_v25 }
  0x26   : > { %581 = vmatmul.f32.vlgmr.msra.gmra.mxu3 %v456_v15 }
  0x2a   : > { %430 = vmatmul.f32.vlgmr.msra.gmra.mxu1 %v305_v14 }
  0x2c   : > { %559 = vmatmul.f32.vlgmr.msrb.gmra.mxu2 %v456_v15 }
  0x32   : > { %535 = vmatmul.f32.vlgmr.msrb.gmra.mxu1 %v458_v23 }
  0x92   : > { %v512_v41 = vpop.f32.mrf.mxu0 }
  0x97   : > { %v311_v30 = vpop.f32.mrf.mxu1  ;;  %v361_v31 = vpop.f32.mrf.mxu2 }
  0x99   : > { %v385_v32 = vpop.f32.mrf.mxu3 }
  0x9f   : > { %v337_v33 = vpop.f32.mrf.mxu1  ;;  %v409_v34 = vpop.f32.mrf.mxu2 }
  0xa0   : > { %v338_v35 = vadd.f32 %v337_v33, %v311_v30 }
  0xa1   : > { %v488_v36 = vpop.f32.mrf.mxu3 }
  0xa2   : > { %v362_v39 = vadd.f32 %v361_v31, %v338_v35 }
  0xa4   : > { %v386_v42 = vadd.f32 %v385_v32, %v362_v39 }
  0xa6   : > { %v410_v46 = vadd.f32 %v409_v34, %v386_v42 }
  0xa7   : > { %v431_v37 = vpop.f32.mrf.mxu1  ;;  %v462_v38 = vpop.f32.mrf.mxu2 }
  0xa8   : > { %v489_v40 = vadd.f32 %v488_v36, %v462_v38  ;;  %v432_v50 = vadd.f32 %v431_v37, %v410_v46 }
  0xa9   : > { %v582_v48 = vpop.f32.mrf.mxu3 }
  0xaa   : > { %v513_v43 = vadd.f32 %v512_v41, %v489_v40 }
  0xaf   : > { %v536_v44 = vpop.f32.mrf.mxu1  ;;  %v560_v45 = vpop.f32.mrf.mxu2 }
  0xb0   : > { %v537_v47 = vadd.f32 %v536_v44, %v513_v43 }
  0xb2   : > { %v561_v49 = vadd.f32 %v560_v45, %v537_v47 }
  0xb4   : > { %v583_v51 = vadd.f32 %v582_v48, %v561_v49 }
  0xb6   : > { %v585_v52 = vmul.f32 %v583_v51, %v432_v50 }
  0xb8   : > { %v586_v53 = vpack.c.bf16 %v585_v52, %v585_v52 }
  0xba   : > { %758 = vmatmul.msk.bf16.vlgmr.msrb.gmra.mxu0 %vm619_vm1, %v586_v53 }
 0x137   : > { %v632_v54 = vpop.f32.mrf.mxu0 }
 0x138   : > { %773 = vtanh.f32 %v632_v54 }
 0x13e   : > { %v774_v55 = vpop.eup %773 }
 0x13f   : > { %v634_v56 = vpop.f32.mrf.mxu0  ;;  %v637_v57 = vmul.f32 %v774_v55, %v774_v55 }
 0x141   : > { %638 = vadd.xlane.f32.xlu0 %v637_v57 }
 0x1b4   : > { %v639_v58 = vpop.xlane.xlu0 %638 }
 0x1b5   : > { %v640_v59 = vmul.f32 0.25, %v639_v58 }
 0x1b7   : > { %v641_v60 = vadd.f32 1e-06, %v640_v59 }
 0x1b9   : > { %775 = vrsqrt.f32 %v641_v60  ;;  %vm648_vm3 = vweird.f32 %v641_v60 }
 0x1bf   : > { %v776_v61 = vpop.eup %775 }
 0x1c0   : > { %v643_v62 = vmul.f32 %v776_v61, %v641_v60  ;;  %vm649_vm2 = vweird.f32 %v776_v61 }
 0x1c1   : > { %vm650_vm4 = vmor %vm648_vm3, %vm649_vm2 }
 0x1c2   : > { %v644_v63 = vmul.f32 %v776_v61, %v643_v62 }
 0x1c4   : > { %v645_v0 = vmul.f32 0.5, %v644_v63 }
 0x1c6   : > { %v646_v1 = vsub.f32 1.5, %v645_v0 }
 0x1c8   : > { %v647_v2 = vmul.f32 %v776_v61, %v646_v1 }
 0x1ca   : > { %v651_v3 = vsel %vm650_vm4, %v776_v61, %v647_v2 }
 0x1cb   : > { %v652_v5 = vmul.f32 %v774_v55, %v651_v3 }
 0x1cd   : > { %v654_v6 = vadd.f32 %v653_v4, %v652_v5 }
 0x1cf   : > { %655 = vst [vmem:[%s280_s24] sm:$0xff] %v654_v6 }
 0x1d0 PF: > { %s16_s21 = sadd.s32 1, %s783_s21  }
 0x1d1   : > { %p13_p4 = scmp.ge.s32.totalorder %s16_s21, 4  }
 0x1d3   :  { %15 = sbr.rel (!%p13_p4) target bundleno = 1 (0x1), region = 80 }

// kernel: _lambda_.13
= control target key start
LH: loop header
LB: loop body
LE: loop exit
PB: predicated region body
PF: predicated region fallthrough
CT: control target
= control target key end

     0   :  { %v237_v0 = vlaneseq  ;;  %vm229_vm0 = vcmask 58368   ;;  %v907_v1 = vmov 0.35355338   ;;  %vm254_vm1 = vcmask 64512   ;;  %s1140_s0 = inlined_call_operand.vmem [shape: f32[8,2,16,8], index: 0, kind: input, shape index: {}, may-alias: {0,1}]   ;;  %s1141_s1 = inlined_call_operand.vmem [shape: f32[8,2,16,8], index: 1, kind: input, shape index: {}, may-alias: {0,1}]   ;;  %s1142_s2 = inlined_call_operand.vmem [shape: f32[8,2,8], index: 2, kind: output, shape index: {0}]   ;;  %s1143_s3 = inlined_call_operand.vmem [shape: f32[8,2,8], index: 3, kind: output, shape index: {1}]  }
   0x1   :  { %231 = vst.msk [vmem:[#allocation3] sm:$0x3] %vm229_vm0, %v907_v1  ;;  %v887_v9 = vld [vmem:[%s1141_s1 + $0xe8] sm:$0xff]  ;;  %v69_v10 = vld [vmem:[%s1140_s0] sm:$0xff]  ;;  %v888_v21 = vld [vmem:[%s1141_s1 + $0xf8] sm:$0xff]  ;;  %vm306_vm2 = vcmask 1041409  }
   0x2   :  { %v238_v2 = vshrl.u32 %v237_v0, 7  ;;  %230 = vst.msk [vmem:[#allocation2] sm:$0x3] %vm229_vm0, %v907_v1  ;;  %v71_v22 = vld [vmem:[%s1140_s0 + $0x10] sm:$0xff]  ;;  %v73_v51 = vld [vmem:[%s1140_s0 + $0x20] sm:$0xff] }
   0x3   :  { %v75_v57 = vld [vmem:[%s1140_s0 + $0x30] sm:$0xff] }
   0x4   :  { %905 = vset.pattern.permute.xlu1 %v238_v2  ;;  %904 = vset.pattern.permute.xlu0 %v238_v2 }
   0x5   :  { %906 = vset.pattern.permute.xlu2 %v238_v2 }
   0x8   :  { %v233_v3 = vld [vmem:[#allocation3] sm:$0x3] }
   0x9   :  { %v271_v4 = vperm.slane %v233_v3, 0  ;;  %889 = vst.msk [vmem:[%s1143_s3 + $0xe] sm:$0x3] %vm229_vm0, %v233_v3  ;;  %v232_v5 = vld [vmem:[#allocation2] sm:$0x3]  ;;  %v278_v7 = vperm.slane %v233_v3, 1 }
   0xa   :  { %v236_v6 = vperm.slane %v232_v5, 0  ;;  %235 = vst.msk [vmem:[%s1142_s2] sm:$0x3] %vm229_vm0, %v232_v5  ;;  %v243_v8 = vperm.slane %v232_v5, 1 }
   0xc   :  { %276 = vperm.xlu1 %905, %v271_v4   ;;  %241 = vperm.xlu0 %904, %v236_v6   ;;  %v885_v6 = vld [vmem:[%s1141_s1 + $0xc8] sm:$0xff] }
  0x14   :  { %283 = vperm.xlu1 %905, %v278_v7   ;;  %248 = vperm.xlu0 %904, %v243_v8  }
  0x7e   :  { %v277_v11 = vpop.permute.xlu1 %276  ;;  %v242_v12 = vpop.permute.xlu0 %241 }
  0x7f   :  { %v288_v13 = vmul.f32 %v887_v9, %v277_v11  ;;  %v252_v14 = vmul.f32 %v242_v12, %v69_v10 }
  0x81   :  { %v290_v15 = vsel %vm254_vm1, %v288_v13, 0.0  ;;  %v255_v16 = vsel %vm254_vm1, %v252_v14, 0.0  ;;  %v886_v14 = vld [vmem:[%s1141_s1 + $0xd8] sm:$0xff] }
  0x82   :  { %v291_v17 = vrot.slane %v290_v15, 4  ;;  %v256_v18 = vrot.slane %v255_v16, 4 }
  0x84   :  { %v292_v19 = vadd.f32 %v291_v17, %v290_v15  ;;  %v257_v20 = vadd.f32 %v256_v18, %v255_v16 }
  0x86   :  { %v293_v23 = vrot.slane %v292_v19, 2  ;;  %v284_v24 = vpop.permute.xlu1 %283  ;;  %v249_v25 = vpop.permute.xlu0 %248  ;;  %v258_v26 = vrot.slane %v257_v20, 2 }
  0x87   :  { %v289_v27 = vmul.f32 %v888_v21, %v284_v24  ;;  %v253_v28 = vmul.f32 %v249_v25, %v71_v22 }
  0x88   :  { %v294_v29 = vadd.f32 %v293_v23, %v292_v19  ;;  %v259_v30 = vadd.f32 %v258_v26, %v257_v20 }
  0x89   :  { %v297_v31 = vsel %vm254_vm1, %v289_v27, 0.0  ;;  %v262_v32 = vsel %vm254_vm1, %v253_v28, 0.0 }
  0x8a   :  { %v298_v33 = vrot.slane %v297_v31, 4  ;;  %v263_v34 = vrot.slane %v262_v32, 4  ;;  %v295_v35 = vrot.slane %v294_v29, 1  ;;  %v260_v36 = vrot.slane %v259_v30, 1 }
  0x8c   :  { %v299_v37 = vadd.f32 %v298_v33, %v297_v31  ;;  %v264_v38 = vadd.f32 %v263_v34, %v262_v32  ;;  %v296_v39 = vadd.f32 %v295_v35, %v294_v29  ;;  %v261_v40 = vadd.f32 %v260_v36, %v259_v30  ;;  %v77_v29 = vld [vmem:[%s1140_s0 + $0x40] sm:$0xff] }
  0x8e   :  { %v300_v41 = vrot.slane %v299_v37, 2  ;;  %v265_v42 = vrot.slane %v264_v38, 2  ;;  %352 = vperm.xlu0 %904, %v296_v39   ;;  %315 = vperm.xlu2 %906, %v261_v40  }
  0x90   :  { %v301_v43 = vadd.f32 %v300_v41, %v299_v37  ;;  %v266_v44 = vadd.f32 %v265_v42, %v264_v38 }
  0x92   :  { %v302_v45 = vrot.slane %v301_v43, 1  ;;  %v267_v46 = vrot.slane %v266_v44, 1 }
  0x94   :  { %v303_v47 = vadd.f32 %v302_v45, %v301_v43  ;;  %v268_v48 = vadd.f32 %v267_v46, %v266_v44 }
  0x96   :  { %358 = vperm.xlu1 %905, %v303_v47   ;;  %v344_v49 = vsel %vm306_vm2, %v303_v47, %v296_v39  ;;  %321 = vperm.xlu2 %906, %v268_v48   ;;  %v307_v50 = vsel %vm306_vm2, %v268_v48, %v261_v40  ;;  %v79_v39 = vld [vmem:[%s1140_s0 + $0x50] sm:$0xff]  ;;  %v884_v40 = vld [vmem:[%s1141_s1 + $0xb8] sm:$0xff] }
  0x97   :  { %891 = vst.msk [vmem:[%s1143_s3 + $0xc] sm:$0x3] %vm229_vm0, %v344_v49 }
  0x98   :  { %890 = vst.msk [vmem:[%s1142_s2 + $0x2] sm:$0x3] %vm229_vm0, %v307_v50 }
  0xe8   :  { %v316_v52 = vpop.permute.xlu2 %315 }
  0xe9   :  { %v326_v53 = vmul.f32 %v316_v52, %v73_v51 }
  0xeb   :  { %v328_v54 = vsel %vm254_vm1, %v326_v53, 0.0 }
  0xec   :  { %v329_v55 = vrot.slane %v328_v54, 4 }
  0xee   :  { %v330_v56 = vadd.f32 %v329_v55, %v328_v54 }
  0xf0   :  { %v331_v58 = vrot.slane %v330_v56, 2  ;;  %v322_v59 = vpop.permute.xlu2 %321 }
  0xf1   :  { %v327_v60 = vmul.f32 %v322_v59, %v75_v57  ;;  %v883_v57 = vld [vmem:[%s1141_s1 + $0xa8] sm:$0xff] }
  0xf2   :  { %v332_v61 = vadd.f32 %v331_v58, %v330_v56 }
  0xf3   :  { %v335_v62 = vsel %vm254_vm1, %v327_v60, 0.0 }
  0xf4   :  { %v336_v63 = vrot.slane %v335_v62, 4  ;;  %v333_v0 = vrot.slane %v332_v61, 1 }
  0xf6   :  { %v337_v1 = vadd.f32 %v336_v63, %v335_v62  ;;  %v334_v2 = vadd.f32 %v333_v0, %v332_v61 }
  0xf8   :  { %v338_v3 = vrot.slane %v337_v1, 2  ;;  %389 = vperm.xlu2 %906, %v334_v2  }
  0xfa   :  { %v339_v4 = vadd.f32 %v338_v3, %v337_v1 }
  0xfc   :  { %v340_v5 = vrot.slane %v339_v4, 1 }
  0xfe   :  { %v341_v7 = vadd.f32 %v340_v5, %v339_v4 }
 0x100   :  { %v353_v8 = vpop.permute.xlu0 %352  ;;  %395 = vperm.xlu0 %904, %v341_v7   ;;  %v381_v9 = vsel %vm306_vm2, %v341_v7, %v334_v2  ;;  %v81_v7 = vld [vmem:[%s1140_s0 + $0x60] sm:$0xff] }
 0x101   :  { %v363_v10 = vmul.f32 %v885_v6, %v353_v8  ;;  %892 = vst.msk [vmem:[%s1142_s2 + $0x4] sm:$0x3] %vm229_vm0, %v381_v9 }
 0x103   :  { %v365_v11 = vsel %vm254_vm1, %v363_v10, 0.0 }
 0x104   :  { %v366_v12 = vrot.slane %v365_v11, 4 }
 0x106   :  { %v367_v13 = vadd.f32 %v366_v12, %v365_v11 }
 0x108   :  { %v368_v15 = vrot.slane %v367_v13, 2  ;;  %v359_v16 = vpop.permute.xlu1 %358 }
 0x109   :  { %v364_v17 = vmul.f32 %v886_v14, %v359_v16 }
 0x10a   :  { %v369_v18 = vadd.f32 %v368_v15, %v367_v13 }
 0x10b   :  { %v372_v19 = vsel %vm254_vm1, %v364_v17, 0.0  ;;  %v881_v17 = vld [vmem:[%s1141_s1 + $0x88] sm:$0xff] }
 0x10c   :  { %v373_v20 = vrot.slane %v372_v19, 4  ;;  %v370_v21 = vrot.slane %v369_v18, 1 }
 0x10e   :  { %v374_v22 = vadd.f32 %v373_v20, %v372_v19  ;;  %v371_v23 = vadd.f32 %v370_v21, %v369_v18 }
 0x110   :  { %v375_v24 = vrot.slane %v374_v22, 2  ;;  %426 = vperm.xlu1 %905, %v371_v23  }
 0x112   :  { %v376_v25 = vadd.f32 %v375_v24, %v374_v22  ;;  %v882_v24 = vld [vmem:[%s1141_s1 + $0x98] sm:$0xff] }
 0x114   :  { %v377_v26 = vrot.slane %v376_v25, 1 }
 0x116   :  { %v378_v27 = vadd.f32 %v377_v26, %v376_v25 }
 0x118   :  { %v418_v28 = vsel %vm306_vm2, %v378_v27, %v371_v23  ;;  %432 = vperm.xlu2 %906, %v378_v27   ;;  %v83_v23 = vld [vmem:[%s1140_s0 + $0x70] sm:$0xff] }
 0x119   :  { %893 = vst.msk [vmem:[%s1143_s3 + $0xa] sm:$0x3] %vm229_vm0, %v418_v28 }
 0x152   :  { %v390_v30 = vpop.permute.xlu2 %389 }
 0x153   :  { %v400_v31 = vmul.f32 %v390_v30, %v77_v29 }
 0x155   :  { %v402_v32 = vsel %vm254_vm1, %v400_v31, 0.0 }
 0x156   :  { %v403_v33 = vrot.slane %v402_v32, 4 }
 0x158   :  { %v404_v34 = vadd.f32 %v403_v33, %v402_v32 }
 0x15a   :  { %v405_v35 = vrot.slane %v404_v34, 2 }
 0x15c   :  { %v406_v36 = vadd.f32 %v405_v35, %v404_v34 }
 0x15e   :  { %v407_v37 = vrot.slane %v406_v36, 1 }
 0x160   :  { %v408_v38 = vadd.f32 %v407_v37, %v406_v36 }
 0x162   :  { %463 = vperm.xlu0 %904, %v408_v38  }
 0x172   :  { %v396_v41 = vpop.permute.xlu0 %395  ;;  %v433_v42 = vpop.permute.xlu2 %432 }
 0x173   :  { %v401_v43 = vmul.f32 %v396_v41, %v79_v39  ;;  %v438_v44 = vmul.f32 %v884_v40, %v433_v42 }
 0x175   :  { %v409_v45 = vsel %vm254_vm1, %v401_v43, 0.0  ;;  %v446_v46 = vsel %vm254_vm1, %v438_v44, 0.0 }
 0x176   :  { %v410_v47 = vrot.slane %v409_v45, 4  ;;  %v447_v48 = vrot.slane %v446_v46, 4 }
 0x178   :  { %v411_v49 = vadd.f32 %v410_v47, %v409_v45  ;;  %v448_v50 = vadd.f32 %v447_v48, %v446_v46 }
 0x17a   :  { %v412_v51 = vrot.slane %v411_v49, 2  ;;  %v449_v52 = vrot.slane %v448_v50, 2 }
 0x17c   :  { %v413_v53 = vadd.f32 %v412_v51, %v411_v49  ;;  %v450_v54 = vadd.f32 %v449_v52, %v448_v50  ;;  %v85_v49 = vld [vmem:[%s1140_s0 + $0x80] sm:$0xff] }
 0x17e   :  { %v414_v55 = vrot.slane %v413_v53, 1  ;;  %v451_v56 = vrot.slane %v450_v54, 1 }
 0x180   :  { %v415_v58 = vadd.f32 %v414_v55, %v413_v53  ;;  %v452_v59 = vadd.f32 %v451_v56, %v450_v54  ;;  %v87_v55 = vld [vmem:[%s1140_s0 + $0x90] sm:$0xff] }
 0x182   :  { %v427_v60 = vpop.permute.xlu1 %426  ;;  %469 = vperm.xlu1 %905, %v415_v58   ;;  %v455_v61 = vsel %vm306_vm2, %v415_v58, %v408_v38  ;;  %506 = vperm.xlu0 %904, %v452_v59  }
 0x183   :  { %v437_v62 = vmul.f32 %v883_v57, %v427_v60  ;;  %894 = vst.msk [vmem:[%s1142_s2 + $0x6] sm:$0x3] %vm229_vm0, %v455_v61 }
 0x185   :  { %v439_v63 = vsel %vm254_vm1, %v437_v62, 0.0 }
 0x186   :  { %v440_v0 = vrot.slane %v439_v63, 4 }
 0x188   :  { %v441_v1 = vadd.f32 %v440_v0, %v439_v63 }
 0x18a   :  { %v442_v2 = vrot.slane %v441_v1, 2 }
 0x18c   :  { %v443_v3 = vadd.f32 %v442_v2, %v441_v1 }
 0x18e   :  { %v444_v4 = vrot.slane %v443_v3, 1 }
 0x190   :  { %v445_v5 = vadd.f32 %v444_v4, %v443_v3  ;;  %v879_v4 = vld [vmem:[%s1141_s1 + $0x68] sm:$0xff] }
 0x192   :  { %500 = vperm.xlu2 %906, %v445_v5   ;;  %v492_v6 = vsel %vm306_vm2, %v452_v59, %v445_v5 }
 0x193   :  { %895 = vst.msk [vmem:[%s1143_s3 + $0x8] sm:$0x3] %vm229_vm0, %v492_v6 }
 0x1d4   :  { %v464_v8 = vpop.permute.xlu0 %463 }
 0x1d5   :  { %v474_v9 = vmul.f32 %v464_v8, %v81_v7 }
 0x1d7   :  { %v476_v10 = vsel %vm254_vm1, %v474_v9, 0.0 }
 0x1d8   :  { %v477_v11 = vrot.slane %v476_v10, 4 }
 0x1da   :  { %v478_v12 = vadd.f32 %v477_v11, %v476_v10 }
 0x1dc   :  { %v479_v13 = vrot.slane %v478_v12, 2 }
 0x1de   :  { %v480_v14 = vadd.f32 %v479_v13, %v478_v12  ;;  %v880_v12 = vld [vmem:[%s1141_s1 + $0x78] sm:$0xff] }
 0x1e0   :  { %v481_v15 = vrot.slane %v480_v14, 1 }
 0x1e2   :  { %v482_v16 = vadd.f32 %v481_v15, %v480_v14 }
 0x1e4   :  { %537 = vperm.xlu1 %905, %v482_v16  }
 0x1ec   :  { %v501_v18 = vpop.permute.xlu2 %500 }
 0x1ed   :  { %v511_v19 = vmul.f32 %v881_v17, %v501_v18 }
 0x1ef   :  { %v513_v20 = vsel %vm254_vm1, %v511_v19, 0.0 }
 0x1f0   :  { %v514_v21 = vrot.slane %v513_v20, 4 }
 0x1f2   :  { %v515_v22 = vadd.f32 %v514_v21, %v513_v20 }
 0x1f4   :  { %v516_v25 = vrot.slane %v515_v22, 2  ;;  %v470_v26 = vpop.permute.xlu1 %469  ;;  %v507_v27 = vpop.permute.xlu0 %506 }
 0x1f5   :  { %v475_v28 = vmul.f32 %v470_v26, %v83_v23  ;;  %v512_v29 = vmul.f32 %v882_v24, %v507_v27  ;;  %v89_v27 = vld [vmem:[%s1140_s0 + $0xa0] sm:$0xff] }
 0x1f6   :  { %v517_v30 = vadd.f32 %v516_v25, %v515_v22 }
 0x1f7   :  { %v483_v31 = vsel %vm254_vm1, %v475_v28, 0.0  ;;  %v520_v32 = vsel %vm254_vm1, %v512_v29, 0.0 }
 0x1f8   :  { %v484_v33 = vrot.slane %v483_v31, 4  ;;  %v521_v34 = vrot.slane %v520_v32, 4  ;;  %v518_v35 = vrot.slane %v517_v30, 1 }
 0x1fa   :  { %v485_v36 = vadd.f32 %v484_v33, %v483_v31  ;;  %v522_v37 = vadd.f32 %v521_v34, %v520_v32  ;;  %v519_v38 = vadd.f32 %v518_v35, %v517_v30 }
 0x1fc   :  { %v486_v39 = vrot.slane %v485_v36, 2  ;;  %v523_v40 = vrot.slane %v522_v37, 2  ;;  %574 = vperm.xlu0 %904, %v519_v38  }
 0x1fe   :  { %v487_v41 = vadd.f32 %v486_v39, %v485_v36  ;;  %v524_v42 = vadd.f32 %v523_v40, %v522_v37  ;;  %v91_v37 = vld [vmem:[%s1140_s0 + $0xb0] sm:$0xff] }
 0x200   :  { %v488_v43 = vrot.slane %v487_v41, 1  ;;  %v525_v44 = vrot.slane %v524_v42, 1 }
 0x202   :  { %v489_v45 = vadd.f32 %v488_v43, %v487_v41  ;;  %v526_v46 = vadd.f32 %v525_v44, %v524_v42 }
 0x204   :  { %543 = vperm.xlu2 %906, %v489_v45   ;;  %v529_v47 = vsel %vm306_vm2, %v489_v45, %v482_v16  ;;  %580 = vperm.xlu1 %905, %v526_v46   ;;  %v566_v48 = vsel %vm306_vm2, %v526_v46, %v519_v38  ;;  %v878_v38 = vld [vmem:[%s1141_s1 + $0x58] sm:$0xff] }
 0x205   :  { %896 = vst.msk [vmem:[%s1142_s2 + $0x8] sm:$0x3] %vm229_vm0, %v529_v47 }
 0x206   :  { %897 = vst.msk [vmem:[%s1143_s3 + $0x6] sm:$0x3] %vm229_vm0, %v566_v48 }
 0x256   :  { %v538_v50 = vpop.permute.xlu1 %537 }
 0x257   :  { %v548_v51 = vmul.f32 %v538_v50, %v85_v49 }
 0x259   :  { %v550_v52 = vsel %vm254_vm1, %v548_v51, 0.0 }
 0x25a   :  { %v551_v53 = vrot.slane %v550_v52, 4 }
 0x25c   :  { %v552_v54 = vadd.f32 %v551_v53, %v550_v52 }
 0x25e   :  { %v553_v56 = vrot.slane %v552_v54, 2  ;;  %v544_v57 = vpop.permute.xlu2 %543 }
 0x25f   :  { %v549_v58 = vmul.f32 %v544_v57, %v87_v55  ;;  %v877_v55 = vld [vmem:[%s1141_s1 + $0x48] sm:$0xff] }
 0x260   :  { %v554_v59 = vadd.f32 %v553_v56, %v552_v54 }
 0x261   :  { %v557_v60 = vsel %vm254_vm1, %v549_v58, 0.0 }
 0x262   :  { %v558_v61 = vrot.slane %v557_v60, 4  ;;  %v555_v62 = vrot.slane %v554_v59, 1 }
 0x264   :  { %v559_v63 = vadd.f32 %v558_v61, %v557_v60  ;;  %v556_v0 = vadd.f32 %v555_v62, %v554_v59 }
 0x266   :  { %v560_v1 = vrot.slane %v559_v63, 2  ;;  %611 = vperm.xlu2 %906, %v556_v0  }
 0x268   :  { %v561_v2 = vadd.f32 %v560_v1, %v559_v63 }
 0x26a   :  { %v562_v3 = vrot.slane %v561_v2, 1 }
 0x26c   :  { %v563_v5 = vadd.f32 %v562_v3, %v561_v2 }
 0x26e   :  { %v575_v6 = vpop.permute.xlu0 %574  ;;  %617 = vperm.xlu0 %904, %v563_v5   ;;  %v603_v7 = vsel %vm306_vm2, %v563_v5, %v556_v0  ;;  %v93_v5 = vld [vmem:[%s1140_s0 + $0xc0] sm:$0xff] }
 0x26f   :  { %v585_v8 = vmul.f32 %v879_v4, %v575_v6  ;;  %898 = vst.msk [vmem:[%s1142_s2 + $0xa] sm:$0x3] %vm229_vm0, %v603_v7 }
 0x271   :  { %v587_v9 = vsel %vm254_vm1, %v585_v8, 0.0 }
 0x272   :  { %v588_v10 = vrot.slane %v587_v9, 4 }
 0x274   :  { %v589_v11 = vadd.f32 %v588_v10, %v587_v9 }
 0x276   :  { %v590_v13 = vrot.slane %v589_v11, 2  ;;  %v581_v14 = vpop.permute.xlu1 %580 }
 0x277   :  { %v586_v15 = vmul.f32 %v880_v12, %v581_v14 }
 0x278   :  { %v591_v16 = vadd.f32 %v590_v13, %v589_v11 }
 0x279   :  { %v594_v17 = vsel %vm254_vm1, %v586_v15, 0.0  ;;  %v875_v15 = vld [vmem:[%s1141_s1 + $0x28] sm:$0xff] }
 0x27a   :  { %v595_v18 = vrot.slane %v594_v17, 4  ;;  %v592_v19 = vrot.slane %v591_v16, 1 }
 0x27c   :  { %v596_v20 = vadd.f32 %v595_v18, %v594_v17  ;;  %v593_v21 = vadd.f32 %v592_v19, %v591_v16 }
 0x27e   :  { %v597_v22 = vrot.slane %v596_v20, 2  ;;  %648 = vperm.xlu1 %905, %v593_v21  }
 0x280   :  { %v598_v23 = vadd.f32 %v597_v22, %v596_v20  ;;  %v876_v22 = vld [vmem:[%s1141_s1 + $0x38] sm:$0xff] }
 0x282   :  { %v599_v24 = vrot.slane %v598_v23, 1 }
 0x284   :  { %v600_v25 = vadd.f32 %v599_v24, %v598_v23 }
 0x286   :  { %654 = vperm.xlu2 %906, %v600_v25   ;;  %v640_v26 = vsel %vm306_vm2, %v600_v25, %v593_v21  ;;  %v95_v21 = vld [vmem:[%s1140_s0 + $0xd0] sm:$0xff] }
 0x287   :  { %899 = vst.msk [vmem:[%s1143_s3 + $0x4] sm:$0x3] %vm229_vm0, %v640_v26 }
 0x2c0   :  { %v612_v28 = vpop.permute.xlu2 %611 }
 0x2c1   :  { %v622_v29 = vmul.f32 %v612_v28, %v89_v27 }
 0x2c3   :  { %v624_v30 = vsel %vm254_vm1, %v622_v29, 0.0 }
 0x2c4   :  { %v625_v31 = vrot.slane %v624_v30, 4 }
 0x2c6   :  { %v626_v32 = vadd.f32 %v625_v31, %v624_v30 }
 0x2c8   :  { %v627_v33 = vrot.slane %v626_v32, 2 }
 0x2ca   :  { %v628_v34 = vadd.f32 %v627_v33, %v626_v32 }
 0x2cc   :  { %v629_v35 = vrot.slane %v628_v34, 1 }
 0x2ce   :  { %v630_v36 = vadd.f32 %v629_v35, %v628_v34 }
 0x2d0   :  { %685 = vperm.xlu0 %904, %v630_v36  }
 0x2e0   :  { %v618_v39 = vpop.permute.xlu0 %617  ;;  %v655_v40 = vpop.permute.xlu2 %654 }
 0x2e1   :  { %v623_v41 = vmul.f32 %v618_v39, %v91_v37  ;;  %v660_v42 = vmul.f32 %v878_v38, %v655_v40 }
 0x2e3   :  { %v631_v43 = vsel %vm254_vm1, %v623_v41, 0.0  ;;  %v668_v44 = vsel %vm254_vm1, %v660_v42, 0.0 }
 0x2e4   :  { %v632_v45 = vrot.slane %v631_v43, 4  ;;  %v669_v46 = vrot.slane %v668_v44, 4 }
 0x2e6   :  { %v633_v47 = vadd.f32 %v632_v45, %v631_v43  ;;  %v670_v48 = vadd.f32 %v669_v46, %v668_v44 }
 0x2e8   :  { %v634_v49 = vrot.slane %v633_v47, 2  ;;  %v671_v50 = vrot.slane %v670_v48, 2 }
 0x2ea   :  { %v635_v51 = vadd.f32 %v634_v49, %v633_v47  ;;  %v672_v52 = vadd.f32 %v671_v50, %v670_v48  ;;  %v97_v47 = vld [vmem:[%s1140_s0 + $0xe0] sm:$0xff] }
 0x2ec   :  { %v636_v53 = vrot.slane %v635_v51, 1  ;;  %v673_v54 = vrot.slane %v672_v52, 1 }
 0x2ee   :  { %v637_v56 = vadd.f32 %v636_v53, %v635_v51  ;;  %v674_v57 = vadd.f32 %v673_v54, %v672_v52  ;;  %v99_v53 = vld [vmem:[%s1140_s0 + $0xf0] sm:$0xff] }
 0x2f0   :  { %v649_v58 = vpop.permute.xlu1 %648  ;;  %691 = vperm.xlu1 %905, %v637_v56   ;;  %v677_v59 = vsel %vm306_vm2, %v637_v56, %v630_v36  ;;  %728 = vperm.xlu0 %904, %v674_v57  }
 0x2f1   :  { %v659_v60 = vmul.f32 %v877_v55, %v649_v58  ;;  %900 = vst.msk [vmem:[%s1142_s2 + $0xc] sm:$0x3] %vm229_vm0, %v677_v59 }
 0x2f3   :  { %v661_v61 = vsel %vm254_vm1, %v659_v60, 0.0 }
 0x2f4   :  { %v662_v62 = vrot.slane %v661_v61, 4 }
 0x2f6   :  { %v663_v63 = vadd.f32 %v662_v62, %v661_v61 }
 0x2f8   :  { %v664_v0 = vrot.slane %v663_v63, 2 }
 0x2fa   :  { %v665_v1 = vadd.f32 %v664_v0, %v663_v63 }
 0x2fc   :  { %v666_v2 = vrot.slane %v665_v1, 1 }
 0x2fe   :  { %v667_v3 = vadd.f32 %v666_v2, %v665_v1 }
 0x300   :  { %722 = vperm.xlu2 %906, %v667_v3   ;;  %v714_v4 = vsel %vm306_vm2, %v674_v57, %v667_v3  ;;  %v873_v3 = vld [vmem:[%s1141_s1 + $0x8] sm:$0xff] }
 0x301   :  { %901 = vst.msk [vmem:[%s1143_s3 + $0x2] sm:$0x3] %vm229_vm0, %v714_v4 }
 0x342   :  { %v686_v6 = vpop.permute.xlu0 %685 }
 0x343   :  { %v696_v7 = vmul.f32 %v686_v6, %v93_v5 }
 0x345   :  { %v698_v8 = vsel %vm254_vm1, %v696_v7, 0.0 }
 0x346   :  { %v699_v9 = vrot.slane %v698_v8, 4 }
 0x348   :  { %v700_v10 = vadd.f32 %v699_v9, %v698_v8 }
 0x34a   :  { %v701_v11 = vrot.slane %v700_v10, 2 }
 0x34c   :  { %v702_v12 = vadd.f32 %v701_v11, %v700_v10  ;;  %v874_v10 = vld [vmem:[%s1141_s1 + $0x18] sm:$0xff] }
 0x34e   :  { %v703_v13 = vrot.slane %v702_v12, 1 }
 0x350   :  { %v704_v14 = vadd.f32 %v703_v13, %v702_v12 }
 0x352   :  { %759 = vperm.xlu1 %905, %v704_v14  }
 0x35a   :  { %v723_v16 = vpop.permute.xlu2 %722 }
 0x35b   :  { %v733_v17 = vmul.f32 %v875_v15, %v723_v16 }
 0x35d   :  { %v735_v18 = vsel %vm254_vm1, %v733_v17, 0.0 }
 0x35e   :  { %v736_v19 = vrot.slane %v735_v18, 4 }
 0x360   :  { %v737_v20 = vadd.f32 %v736_v19, %v735_v18 }
 0x362   :  { %v738_v23 = vrot.slane %v737_v20, 2  ;;  %v692_v24 = vpop.permute.xlu1 %691  ;;  %v729_v25 = vpop.permute.xlu0 %728 }
 0x363   :  { %v697_v26 = vmul.f32 %v692_v24, %v95_v21  ;;  %v734_v27 = vmul.f32 %v876_v22, %v729_v25 }
 0x364   :  { %v739_v28 = vadd.f32 %v738_v23, %v737_v20 }
 0x365   :  { %v705_v29 = vsel %vm254_vm1, %v697_v26, 0.0  ;;  %v742_v30 = vsel %vm254_vm1, %v734_v27, 0.0 }
 0x366   :  { %v706_v31 = vrot.slane %v705_v29, 4  ;;  %v743_v32 = vrot.slane %v742_v30, 4  ;;  %v740_v33 = vrot.slane %v739_v28, 1 }
 0x368   :  { %v707_v34 = vadd.f32 %v706_v31, %v705_v29  ;;  %v744_v35 = vadd.f32 %v743_v32, %v742_v30  ;;  %v741_v36 = vadd.f32 %v740_v33, %v739_v28 }
 0x36a   :  { %v708_v37 = vrot.slane %v707_v34, 2  ;;  %v745_v38 = vrot.slane %v744_v35, 2  ;;  %795 = vperm.xlu0 %904, %v741_v36  }
 0x36c   :  { %v709_v39 = vadd.f32 %v708_v37, %v707_v34  ;;  %v746_v40 = vadd.f32 %v745_v38, %v744_v35 }
 0x36e   :  { %v710_v41 = vrot.slane %v709_v39, 1  ;;  %v747_v42 = vrot.slane %v746_v40, 1 }
 0x370   :  { %v711_v43 = vadd.f32 %v710_v41, %v709_v39  ;;  %v748_v44 = vadd.f32 %v747_v42, %v746_v40 }
 0x372   :  { %765 = vperm.xlu2 %906, %v711_v43   ;;  %v751_v45 = vsel %vm306_vm2, %v711_v43, %v704_v14  ;;  %801 = vperm.xlu1 %905, %v748_v44   ;;  %v788_v46 = vsel %vm306_vm2, %v748_v44, %v741_v36 }
 0x373   :  { %902 = vst.msk [vmem:[%s1142_s2 + $0xe] sm:$0x3] %vm229_vm0, %v751_v45 }
 0x374   :  { %790 = vst.msk [vmem:[%s1143_s3] sm:$0x3] %vm229_vm0, %v788_v46 }
 0x3c4   :  { %v760_v48 = vpop.permute.xlu1 %759 }
 0x3c5   :  { %v770_v49 = vmul.f32 %v760_v48, %v97_v47 }
 0x3c7   :  { %v772_v50 = vsel %vm254_vm1, %v770_v49, 0.0 }
 0x3c8   :  { %v773_v51 = vrot.slane %v772_v50, 4 }
 0x3ca   :  { %v774_v52 = vadd.f32 %v773_v51, %v772_v50 }
 0x3cc   :  { %v766_v54 = vpop.permute.xlu2 %765  ;;  %v775_v56 = vrot.slane %v774_v52, 2 }
 0x3cd   :  { %v771_v55 = vmul.f32 %v766_v54, %v99_v53 }
 0x3ce   :  { %v776_v59 = vadd.f32 %v775_v56, %v774_v52 }
 0x3cf   :  { %v779_v57 = vsel %vm254_vm1, %v771_v55, 0.0 }
 0x3d0   :  { %v780_v58 = vrot.slane %v779_v57, 4  ;;  %v777_v62 = vrot.slane %v776_v59, 1 }
 0x3d2   :  { %v781_v60 = vadd.f32 %v780_v58, %v779_v57  ;;  %v778_v1 = vadd.f32 %v777_v62, %v776_v59 }
 0x3d4   :  { %v782_v61 = vrot.slane %v781_v60, 2 }
 0x3d6   :  { %v783_v63 = vadd.f32 %v782_v61, %v781_v60 }
 0x3d8   :  { %v784_v0 = vrot.slane %v783_v63, 1 }
 0x3da   :  { %v785_v2 = vadd.f32 %v784_v0, %v783_v63 }
 0x3dc   :  { %v823_v4 = vsel %vm306_vm2, %v785_v2, %v778_v1  ;;  %v796_v5 = vpop.permute.xlu0 %795 }
 0x3dd   :  { %825 = vst.msk [vmem:[#allocation2] sm:$0x3] %vm229_vm0, %v823_v4  ;;  %v805_v6 = vmul.f32 %v873_v3, %v796_v5 }
 0x3df   :  { %v807_v7 = vsel %vm254_vm1, %v805_v6, 0.0 }
 0x3e0   :  { %v808_v8 = vrot.slane %v807_v7, 4 }
 0x3e2   :  { %v809_v9 = vadd.f32 %v808_v8, %v807_v7 }
 0x3e4   :  { %v802_v11 = vpop.permute.xlu1 %801  ;;  %v810_v13 = vrot.slane %v809_v9, 2 }
 0x3e5   :  { %v806_v12 = vmul.f32 %v874_v10, %v802_v11 }
 0x3e6   :  { %v811_v16 = vadd.f32 %v810_v13, %v809_v9 }
 0x3e7   :  { %v814_v14 = vsel %vm254_vm1, %v806_v12, 0.0 }
 0x3e8   :  { %v815_v15 = vrot.slane %v814_v14, 4  ;;  %v812_v19 = vrot.slane %v811_v16, 1 }
 0x3ea   :  { %v816_v17 = vadd.f32 %v815_v15, %v814_v14  ;;  %v813_v22 = vadd.f32 %v812_v19, %v811_v16 }
 0x3ec   :  { %v817_v18 = vrot.slane %v816_v17, 2 }
 0x3ee   :  { %v818_v20 = vadd.f32 %v817_v18, %v816_v17 }
 0x3f0   :  { %v819_v21 = vrot.slane %v818_v20, 1 }
 0x3f2   :  { %v820_v23 = vadd.f32 %v819_v21, %v818_v20 }
 0x3f4   :  { %v828_v24 = vsel %vm306_vm2, %v820_v23, %v813_v22 }
 0x3f5   :  { %830 = vst.msk [vmem:[#allocation3] sm:$0x3] %vm229_vm0, %v828_v24 }

</bundles_post_ra>
